<compile_context>
chip_gen: v7x
topology: tpu7x:2x2x1
jax: 0.10.0
libtpu: 0.0.40
codegen_flags: <defaults>
</compile_context>

<pallas_src>
import jax
import jax.numpy as jnp
from jax import lax
from jax.experimental import pallas as pl
from jax.experimental.pallas import tpu as pltpu


def _ceil_to(x, m):
    return (x + m - 1) // m * m


# ----------------------------- Pallas kernel -----------------------------
def _make_kernel(Ho, Wo, Wp, cin4, cmidp, coutp):
    HW = Ho * Wo
    f32 = jnp.float32
    bf16 = jnp.bfloat16

    def swish(v):
        return v * jax.nn.sigmoid(v)

    def kernel(xd_ref,
               s1_ref, t1_ref, sS_ref, tS_ref,     # folded BN scale/shift, tiled to 4*Cin
               w1_ref, b1_ref,                     # residual conv1 taps (4, 4*Cin, Cmidp)
               s2_ref, t2_ref,                     # folded BN2 scale/shift (1, Cmidp)
               w2_ref, b2_ref,                     # residual conv2 taps (9, Cmidp, Coutp)
               wS_ref, bS_ref,                     # skip conv taps (4, 4*Cin, Coutp)
               out_ref,
               halo, midh):
        # ---- refresh thin zero borders only (never written by the body). ----
        # Done every step (cheap) rather than under pl.when(program_id==0) so the
        # per-core scratch is valid on whichever TensorCore runs this grid index.
        halo[0:1, :, :] = jnp.zeros((1, Wp, cin4), f32)              # top pad row
        halo[:, Wo:Wp, :] = jnp.zeros((Ho + 1, Wp - Wo, cin4), f32)  # right pad cols
        midh[0:1, :, :] = jnp.zeros((1, Wp, cmidp), f32)             # top pad row
        midh[Ho + 1:Ho + 2, :, :] = jnp.zeros((1, Wp, cmidp), f32)   # bottom pad row
        midh[:, Wo:Wp, :] = jnp.zeros((Ho + 2, Wp - Wo, cmidp), f32)

        x = xd_ref[0].astype(f32)                   # (Ho, Wo, 4*Cin) space-to-depth input

        def bn_swish(s_ref, t_ref):                 # folded eval-mode BN + Swish (f32 VPU/EUP)
            return swish(x * s_ref[...].reshape(1, 1, cin4)
                         + t_ref[...].reshape(1, 1, cin4))

        def conv_s2(w_ref, b_ref):
            """3x3/stride-2 conv == 2x2/stride-1 conv over the space-to-depth
            activation currently stored in `halo`.  4 accumulated MXU matmuls;
            W-shifted taps come from an XLU roll against the zero right pad."""
            full = halo[...]                                       # (Ho+1, Wp, 4*Cin)
            rolled = pltpu.roll(full, 1, axis=1)                   # zero enters at col 0
            acc = None
            for u in range(2):
                for v in range(2):
                    src = rolled if v == 0 else full
                    tap = src[u:u + Ho, :Wo, :].reshape(HW, cin4).astype(bf16)
                    d = jnp.dot(tap, w_ref[u * 2 + v], preferred_element_type=f32)
                    acc = d if acc is None else acc + d
            return acc + b_ref[...]                                # (HW, n_out) f32

        # ---- skip branch first; store it so its live range ends here ----
        halo[1:Ho + 1, 0:Wo, :] = bn_swish(sS_ref, tS_ref)
        out_ref[0] = conv_s2(wS_ref, bS_ref)

        # ---- residual conv1 (stride 2), reusing the same halo buffer ----
        halo[1:Ho + 1, 0:Wo, :] = bn_swish(s1_ref, t1_ref)
        mid = conv_s2(w1_ref, b1_ref)                              # (HW, Cmidp) f32

        # ---- BN2 (folded) + Swish; zero-padded channels stay exactly 0 ----
        mid = swish(mid * s2_ref[...] + t2_ref[...])
        midh[1:Ho + 1, 0:Wo, :] = mid.reshape(Ho, Wo, cmidp)

        # ---- residual conv2: 3x3 stride-1 as 9 accumulated MXU matmuls ----
        full = midh[...]                                           # (Ho+2, Wp, Cmidp)
        roll_p = pltpu.roll(full, 1, axis=1)                       # dx == 0 taps
        roll_m = pltpu.roll(full, Wp - 1, axis=1)                  # dx == 2 taps (roll by -1)
        acc = None
        for dy in range(3):
            for dx, src in enumerate((roll_p, full, roll_m)):
                tap = src[dy:dy + Ho, :Wo, :].reshape(HW, cmidp).astype(bf16)
                d = jnp.dot(tap, w2_ref[dy * 3 + dx], preferred_element_type=f32)
                acc = d if acc is None else acc + d

        # ---- skip + residual ----
        out_ref[0] = out_ref[0] + acc + b2_ref[...]

    return kernel


# --------------------------- wrapper-side glue ---------------------------
def _fold_bn(bn, eps=1e-5):
    scale = bn["gamma"] * lax.rsqrt(bn["var"] + eps)
    shift = bn["beta"] - bn["mean"] * scale
    return scale, shift


def _space_to_depth(x):
    """(B, H, W, C) -> (B, H//2, W//2, 4*C), last dim ordered (py, px, c)."""
    B, H, W, C = x.shape
    x = x.reshape(B, H // 2, 2, W // 2, 2, C)
    x = x.transpose(0, 1, 3, 2, 4, 5)
    return x.reshape(B, H // 2, W // 2, 4 * C)


def _dform_weight_taps(w, co_pad):
    """(3,3,Ci,Co) HWIO conv weight -> (4, 4*Ci, co_pad): per-tap weights of the
    equivalent 2x2 stride-1 conv over the space-to-depth input.  Tap index is
    u*2+v; row order inside a tap is (py, px, c), matching the packing."""
    Ci, Co = w.shape[2], w.shape[3]
    wd = jnp.zeros((2, 2, 2, 2, Ci, Co), w.dtype)
    for dy in range(3):
        u, py = (0, 1) if dy == 0 else (1, dy - 1)
        for dx in range(3):
            v, px = (0, 1) if dx == 0 else (1, dx - 1)
            wd = wd.at[u, v, py, px].set(w[dy, dx])
    wd = wd.reshape(4, 4 * Ci, Co)
    return jnp.pad(wd, ((0, 0), (0, 0), (0, co_pad - Co)))


def _pad1d(v, n):
    return jnp.pad(v, (0, n - v.shape[0]))


def _vmem_limit_bytes(Ho, Wo, Wp, cin4, cmidp, coutp):
    f32b, bf16b = 4, 2
    hw = Ho * Wo
    blocks = 2 * (hw * cin4 * bf16b + hw * coutp * f32b)             # double-buffered I/O
    scratch = (Ho + 1) * Wp * cin4 * f32b + (Ho + 2) * Wp * cmidp * f32b
    weights = 2 * (4 * cin4 * cmidp + 4 * cin4 * coutp + 9 * cmidp * coutp) * bf16b
    live = hw * (cin4 + 2 * cmidp + 2 * coutp) * f32b                # rolls / accumulators
    est = blocks + scratch + weights + live + (1 << 20)
    return int(min(64 * 2**20, max(4 * 2**20, 3 * est)))


@jax.jit
def resnet_downscale_block(x_nchw, params):
    """Pallas forward of ResNetDownscaleBlock (scale=2, no bottleneck / SN).
    x: (B, Cin, H, W) -> (B, Cout, H//2, W//2)."""
    x = jnp.transpose(x_nchw, (0, 2, 3, 1)).astype(jnp.float32)       # NHWC
    B, H, W, cin = x.shape
    assert H % 2 == 0 and W % 2 == 0, "scale=2 downscale needs even H, W"
    Ho, Wo = H // 2, W // 2
    assert Wo % 8 == 0, "half-width must be 8-aligned (see TODO at top)"
    r, s = params["res"], params["skip"]
    cmid, cout = r["w1"].shape[3], r["w2"].shape[3]
    cin4 = 4 * cin
    cmidp = _ceil_to(cmid, 128)      # lane-dense mid activation / matmul N & K dims
    coutp = _ceil_to(cout, 128)      # lane-dense output stores
    Wp = Wo + 8                      # zero pad columns on the right (roll trick)
    HW = Ho * Wo

    # XLA-side layout plumbing & parameter folding (no heavy compute hoisted)
    xd = _space_to_depth(x).astype(jnp.bfloat16)                      # (B, Ho, Wo, 4*Cin)
    s1, t1 = _fold_bn(r["bn1"])
    s2, t2 = _fold_bn(r["bn2"])
    sS, tS = _fold_bn(s["bn"])
    w2p = jnp.pad(r["w2"], ((0, 0), (0, 0), (0, cmidp - cmid), (0, coutp - cout)))
    args = [
        xd,
        jnp.tile(s1, 4)[None], jnp.tile(t1, 4)[None],                 # residual BN1 (tiled to 4*Cin)
        jnp.tile(sS, 4)[None], jnp.tile(tS, 4)[None],                 # skip BN
        _dform_weight_taps(r["w1"], cmidp).astype(jnp.bfloat16),      # conv1 taps (stride 2)
        _pad1d(r["b1"], cmidp)[None],
        _pad1d(s2, cmidp)[None], _pad1d(t2, cmidp)[None],             # BN2
        w2p.reshape(9, cmidp, coutp).astype(jnp.bfloat16),            # conv2 taps (stride 1)
        _pad1d(r["b2"], coutp)[None],
        _dform_weight_taps(s["w"], coutp).astype(jnp.bfloat16),       # skip conv taps (stride 2)
        _pad1d(s["b"], coutp)[None],
    ]

    def batched(shape):
        n = len(shape) - 1
        return pl.BlockSpec((1,) + tuple(shape[1:]),
                            lambda b, _n=n: (b,) + (0,) * _n)

    def shared(shape):
        n = len(shape)
        return pl.BlockSpec(tuple(shape), lambda b, _n=n: (0,) * _n)

    out = pl.pallas_call(
        _make_kernel(Ho, Wo, Wp, cin4, cmidp, coutp),
        out_shape=jax.ShapeDtypeStruct((B, HW, coutp), jnp.float32),
        grid=(B,),
        in_specs=[batched(xd.shape)] + [shared(a.shape) for a in args[1:]],
        out_specs=batched((B, HW, coutp)),
        scratch_shapes=[
            pltpu.VMEM((Ho + 1, Wp, cin4), jnp.float32),   # shared stride-2 halo (skip & residual)
            pltpu.VMEM((Ho + 2, Wp, cmidp), jnp.float32),  # stride-1 conv halo
        ],
        compiler_params=pltpu.CompilerParams(
            dimension_semantics=("parallel",),
            vmem_limit_bytes=_vmem_limit_bytes(Ho, Wo, Wp, cin4, cmidp, coutp),
        ),
    )(*args)

    out = out.reshape(B, Ho, Wo, coutp)[..., :cout]
    return jnp.transpose(out, (0, 3, 1, 2))                           # NCHW


# -------------------------- pure-JAX reference --------------------------
def reference(x_nchw, params):
    x = jnp.transpose(x_nchw, (0, 2, 3, 1))

    def bn_swish(v, bn):
        sc, sh = _fold_bn(bn)
        v = v * sc + sh
        return v * jax.nn.sigmoid(v)

    def conv(v, w, b, stride):
        o = lax.conv_general_dilated(
            v, w, (stride, stride), ((1, 1), (1, 1)),
            dimension_numbers=("NHWC", "HWIO", "NHWC"),
            precision=lax.Precision.HIGHEST)
        return o + b.reshape(1, 1, 1, -1)

    r, s = params["res"], params["skip"]
    res = conv(bn_swish(x, r["bn1"]), r["w1"], r["b1"], 2)
    res = conv(bn_swish(res, r["bn2"]), r["w2"], r["b2"], 1)
    sk = conv(bn_swish(x, s["bn"]), s["w"], s["b"], 2)
    return jnp.transpose(sk + res, (0, 3, 1, 2))


# -------------------------- parameter init --------------------------
def init_params(key, cin, cmid, cout):
    ks = iter(jax.random.split(key, 32))

    def nrm(shape, scale=0.3):
        return (scale * jax.random.normal(next(ks), shape)).astype(jnp.float32)

    def bn(c):
        return {
            "gamma": (1.0 + 0.2 * jax.random.normal(next(ks), (c,))).astype(jnp.float32),
            "beta": nrm((c,), 0.1),
            "mean": nrm((c,), 0.2),
            "var": ((1.0 + 0.1 * jax.random.normal(next(ks), (c,))) ** 2).astype(jnp.float32),
        }

    return {
        "res": {
            "bn1": bn(cin),
            "w1": nrm((3, 3, cin, cmid)),   # HWIO (PyTorch OIHW -> transpose(2,3,1,0))
            "b1": nrm((cmid,), 0.1),
            "bn2": bn(cmid),
            "w2": nrm((3, 3, cmid, cout)),
            "b2": nrm((cout,), 0.1),
        },
        "skip": {
            "bn": bn(cin),
            "w": nrm((3, 3, cin, cout)),
            "b": nrm((cout,), 0.1),
        },
    }


if __name__ == "__main__":
    B, Cin, Cout, Hs, Ws = 2, 4, 8, 16, 16
    Cmid = Cout                      # mid_channels defaults to out_channels

    key = jax.random.PRNGKey(0)
    k_x, k_p = jax.random.split(key)
    x = jax.random.normal(k_x, (B, Cin, Hs, Ws), dtype=jnp.float32)
    params = init_params(k_p, Cin, Cmid, Cout)

    out = jax.block_until_ready(resnet_downscale_block(x, params))
    ref = jax.block_until_ready(reference(x, params))

    assert out.shape == (B, Cout, Hs // 2, Ws // 2), out.shape
    err = float(jnp.max(jnp.abs(out - ref)))
    # Kernel matmuls use bf16 operands with f32 accumulation (the MXU's native
    # mode) and the input is bf16; the reference runs at HIGHEST f32 precision,
    # so allow bf16-grade tolerance.
    tol = 2e-2 + 2e-2 * float(jnp.max(jnp.abs(ref)))
    assert err < tol, f"mismatch vs reference: {err} (tol {tol})"
    print("KERNEL_OK")
</pallas_src>

<mosaic_0001>
module attributes {stable_mosaic.version = 11 : i64} {
  func.func @kernel(%arg0: i32, %arg1: memref<1x8x8x16xbf16, #tpu.memory_space<vmem>>, %arg2: memref<1x16xf32, #tpu.memory_space<vmem>>, %arg3: memref<1x16xf32, #tpu.memory_space<vmem>>, %arg4: memref<1x16xf32, #tpu.memory_space<vmem>>, %arg5: memref<1x16xf32, #tpu.memory_space<vmem>>, %arg6: memref<4x16x128xbf16, #tpu.memory_space<vmem>>, %arg7: memref<1x128xf32, #tpu.memory_space<vmem>>, %arg8: memref<1x128xf32, #tpu.memory_space<vmem>>, %arg9: memref<1x128xf32, #tpu.memory_space<vmem>>, %arg10: memref<9x128x128xbf16, #tpu.memory_space<vmem>>, %arg11: memref<1x128xf32, #tpu.memory_space<vmem>>, %arg12: memref<4x16x128xbf16, #tpu.memory_space<vmem>>, %arg13: memref<1x128xf32, #tpu.memory_space<vmem>>, %arg14: memref<1x64x128xf32, #tpu.memory_space<vmem>>, %arg15: memref<9x16x16xf32, #tpu.memory_space<vmem>>, %arg16: memref<10x16x128xf32, #tpu.memory_space<vmem>>) attributes {dimension_semantics = [#tpu.dimension_semantics<parallel>], iteration_bounds = array<i64: 2>, scalar_prefetch = 0 : i64, scratch_operands = 2 : i64, tpu.core_type = #tpu.core_type<tc>, window_params = [{transform_indices = @transform_0, window_bounds = array<i64: 1, 8, 8, 16>}, {pipeline_mode = #tpu.pipeline_mode<synchronous>, transform_indices = @transform_1, window_bounds = array<i64: 1, 16>}, {pipeline_mode = #tpu.pipeline_mode<synchronous>, transform_indices = @transform_2, window_bounds = array<i64: 1, 16>}, {pipeline_mode = #tpu.pipeline_mode<synchronous>, transform_indices = @transform_3, window_bounds = array<i64: 1, 16>}, {pipeline_mode = #tpu.pipeline_mode<synchronous>, transform_indices = @transform_4, window_bounds = array<i64: 1, 16>}, {pipeline_mode = #tpu.pipeline_mode<synchronous>, transform_indices = @transform_5, window_bounds = array<i64: 4, 16, 128>}, {pipeline_mode = #tpu.pipeline_mode<synchronous>, transform_indices = @transform_6, window_bounds = array<i64: 1, 128>}, {pipeline_mode = #tpu.pipeline_mode<synchronous>, transform_indices = @transform_7, window_bounds = array<i64: 1, 128>}, {pipeline_mode = #tpu.pipeline_mode<synchronous>, transform_indices = @transform_8, window_bounds = array<i64: 1, 128>}, {pipeline_mode = #tpu.pipeline_mode<synchronous>, transform_indices = @transform_9, window_bounds = array<i64: 9, 128, 128>}, {pipeline_mode = #tpu.pipeline_mode<synchronous>, transform_indices = @transform_10, window_bounds = array<i64: 1, 128>}, {pipeline_mode = #tpu.pipeline_mode<synchronous>, transform_indices = @transform_11, window_bounds = array<i64: 4, 16, 128>}, {pipeline_mode = #tpu.pipeline_mode<synchronous>, transform_indices = @transform_12, window_bounds = array<i64: 1, 128>}, {transform_indices = @transform_13, window_bounds = array<i64: 1, 64, 128>}]} {
    %cst = arith.constant 0.000000e+00 : f32
    %0 = vector.broadcast %cst : f32 to vector<1x16x16xf32>
    %c0 = arith.constant 0 : index
    %c0_0 = arith.constant 0 : index
    %c0_1 = arith.constant 0 : index
    %1 = vector.load %arg15[%c0, %c0_0, %c0_1] : memref<9x16x16xf32, #tpu.memory_space<vmem>>, vector<1x16x16xf32>
    tpu.vector_store %arg15[%c0, %c0_0, %c0_1], %0 {strides = array<i32>} : memref<9x16x16xf32, #tpu.memory_space<vmem>>, vector<1x16x16xf32>,
    %cst_2 = arith.constant 0.000000e+00 : f32
    %2 = vector.broadcast %cst_2 : f32 to vector<9x8x16xf32>
    %c0_3 = arith.constant 0 : index
    %c8 = arith.constant 8 : index
    %c0_4 = arith.constant 0 : index
    %3 = vector.load %arg15[%c0_3, %c8, %c0_4] : memref<9x16x16xf32, #tpu.memory_space<vmem>>, vector<9x8x16xf32>
    tpu.vector_store %arg15[%c0_3, %c8, %c0_4], %2 {strides = array<i32>} : memref<9x16x16xf32, #tpu.memory_space<vmem>>, vector<9x8x16xf32>,
    %cst_5 = arith.constant 0.000000e+00 : f32
    %4 = vector.broadcast %cst_5 : f32 to vector<1x16x128xf32>
    %c0_6 = arith.constant 0 : index
    %c0_7 = arith.constant 0 : index
    %c0_8 = arith.constant 0 : index
    %5 = vector.load %arg16[%c0_6, %c0_7, %c0_8] : memref<10x16x128xf32, #tpu.memory_space<vmem>>, vector<1x16x128xf32>
    tpu.vector_store %arg16[%c0_6, %c0_7, %c0_8], %4 {strides = array<i32>} : memref<10x16x128xf32, #tpu.memory_space<vmem>>, vector<1x16x128xf32>,
    %cst_9 = arith.constant 0.000000e+00 : f32
    %6 = vector.broadcast %cst_9 : f32 to vector<1x16x128xf32>
    %c9 = arith.constant 9 : index
    %c0_10 = arith.constant 0 : index
    %c0_11 = arith.constant 0 : index
    %7 = vector.load %arg16[%c9, %c0_10, %c0_11] : memref<10x16x128xf32, #tpu.memory_space<vmem>>, vector<1x16x128xf32>
    tpu.vector_store %arg16[%c9, %c0_10, %c0_11], %6 {strides = array<i32>} : memref<10x16x128xf32, #tpu.memory_space<vmem>>, vector<1x16x128xf32>,
    %cst_12 = arith.constant 0.000000e+00 : f32
    %8 = vector.broadcast %cst_12 : f32 to vector<10x8x128xf32>
    %c0_13 = arith.constant 0 : index
    %c8_14 = arith.constant 8 : index
    %c0_15 = arith.constant 0 : index
    %9 = vector.load %arg16[%c0_13, %c8_14, %c0_15] : memref<10x16x128xf32, #tpu.memory_space<vmem>>, vector<10x8x128xf32>
    tpu.vector_store %arg16[%c0_13, %c8_14, %c0_15], %8 {strides = array<i32>} : memref<10x16x128xf32, #tpu.memory_space<vmem>>, vector<10x8x128xf32>,
    %c0_16 = arith.constant 0 : index
    %c0_17 = arith.constant 0 : index
    %c0_18 = arith.constant 0 : index
    %c0_19 = arith.constant 0 : index
    %10 = vector.load %arg1[%c0_16, %c0_17, %c0_18, %c0_19] : memref<1x8x8x16xbf16, #tpu.memory_space<vmem>>, vector<1x8x8x16xbf16>
    %11 = vector.shape_cast %10 : vector<1x8x8x16xbf16> to vector<8x8x16xbf16>
    %12 = arith.extf %11 : vector<8x8x16xbf16> to vector<8x8x16xf32>
    %c0_20 = arith.constant 0 : index
    %c0_21 = arith.constant 0 : index
    %13 = vector.load %arg4[%c0_20, %c0_21] : memref<1x16xf32, #tpu.memory_space<vmem>>, vector<1x16xf32>
    %14 = vector.shape_cast %13 : vector<1x16xf32> to vector<1x1x16xf32>
    %15 = vector.broadcast %14 : vector<1x1x16xf32> to vector<8x8x16xf32>
    %16 = arith.mulf %12, %15 : vector<8x8x16xf32>
    %c0_22 = arith.constant 0 : index
    %c0_23 = arith.constant 0 : index
    %17 = vector.load %arg5[%c0_22, %c0_23] : memref<1x16xf32, #tpu.memory_space<vmem>>, vector<1x16xf32>
    %18 = vector.shape_cast %17 : vector<1x16xf32> to vector<1x1x16xf32>
    %19 = vector.broadcast %18 : vector<1x1x16xf32> to vector<8x8x16xf32>
    %20 = arith.addf %16, %19 : vector<8x8x16xf32>
    %21 = arith.negf %20 : vector<8x8x16xf32>
    %22 = math.exp %21 : vector<8x8x16xf32>
    %cst_24 = arith.constant 1.000000e+00 : f32
    %23 = vector.broadcast %cst_24 : f32 to vector<8x8x16xf32>
    %24 = arith.addf %23, %22 : vector<8x8x16xf32>
    %25 = arith.divf %23, %24 : vector<8x8x16xf32>
    %26 = arith.mulf %20, %25 : vector<8x8x16xf32>
    %c1 = arith.constant 1 : index
    %c0_25 = arith.constant 0 : index
    %c0_26 = arith.constant 0 : index
    %27 = vector.load %arg15[%c1, %c0_25, %c0_26] : memref<9x16x16xf32, #tpu.memory_space<vmem>>, vector<8x8x16xf32>
    tpu.vector_store %arg15[%c1, %c0_25, %c0_26], %26 {strides = array<i32>} : memref<9x16x16xf32, #tpu.memory_space<vmem>>, vector<8x8x16xf32>,
    %c0_27 = arith.constant 0 : index
    %c0_28 = arith.constant 0 : index
    %c0_29 = arith.constant 0 : index
    %28 = vector.load %arg15[%c0_27, %c0_28, %c0_29] : memref<9x16x16xf32, #tpu.memory_space<vmem>>, vector<9x16x16xf32>
    %c1_i32 = arith.constant 1 : i32
    %29 = tpu.dynamic_rotate %28 by %c1_i32 dim 1 : vector<9x16x16xf32>, i32 -> vector<9x16x16xf32>
    %30 = vector.extract_strided_slice %29 {offsets = [0, 0, 0], sizes = [8, 8, 16], strides = [1, 1, 1]} : vector<9x16x16xf32> to vector<8x8x16xf32>
    %31 = vector.shape_cast %30 : vector<8x8x16xf32> to vector<64x16xf32>
    %32 = arith.truncf %31 : vector<64x16xf32> to vector<64x16xbf16>
    %c0_30 = arith.constant 0 : index
    %c0_31 = arith.constant 0 : index
    %c0_32 = arith.constant 0 : index
    %33 = vector.load %arg12[%c0_30, %c0_31, %c0_32] : memref<4x16x128xbf16, #tpu.memory_space<vmem>>, vector<1x16x128xbf16>
    %34 = vector.shape_cast %33 : vector<1x16x128xbf16> to vector<16x128xbf16>
    %cst_33 = arith.constant dense<0.000000e+00> : vector<64x128xf32>
    %35 = tpu.matmul %32, %34, %cst_33 {dimension_numbers = #tpu.dot_dimension_numbers<[1], [0], [0], [1], [0, 0, 1, 1], [], []>} : vector<64x16xbf16>, vector<16x128xbf16>, vector<64x128xf32> -> vector<64x128xf32>
    %36 = vector.extract_strided_slice %28 {offsets = [0, 0, 0], sizes = [8, 8, 16], strides = [1, 1, 1]} : vector<9x16x16xf32> to vector<8x8x16xf32>
    %37 = vector.shape_cast %36 : vector<8x8x16xf32> to vector<64x16xf32>
    %38 = arith.truncf %37 : vector<64x16xf32> to vector<64x16xbf16>
    %c1_34 = arith.constant 1 : index
    %c0_35 = arith.constant 0 : index
    %c0_36 = arith.constant 0 : index
    %39 = vector.load %arg12[%c1_34, %c0_35, %c0_36] : memref<4x16x128xbf16, #tpu.memory_space<vmem>>, vector<1x16x128xbf16>
    %40 = vector.shape_cast %39 : vector<1x16x128xbf16> to vector<16x128xbf16>
    %cst_37 = arith.constant dense<0.000000e+00> : vector<64x128xf32>
    %41 = tpu.matmul %38, %40, %cst_37 {dimension_numbers = #tpu.dot_dimension_numbers<[1], [0], [0], [1], [0, 0, 1, 1], [], []>} : vector<64x16xbf16>, vector<16x128xbf16>, vector<64x128xf32> -> vector<64x128xf32>
    %42 = arith.addf %35, %41 : vector<64x128xf32>
    %43 = vector.extract_strided_slice %29 {offsets = [1, 0, 0], sizes = [8, 8, 16], strides = [1, 1, 1]} : vector<9x16x16xf32> to vector<8x8x16xf32>
    %44 = vector.shape_cast %43 : vector<8x8x16xf32> to vector<64x16xf32>
    %45 = arith.truncf %44 : vector<64x16xf32> to vector<64x16xbf16>
    %c2 = arith.constant 2 : index
    %c0_38 = arith.constant 0 : index
    %c0_39 = arith.constant 0 : index
    %46 = vector.load %arg12[%c2, %c0_38, %c0_39] : memref<4x16x128xbf16, #tpu.memory_space<vmem>>, vector<1x16x128xbf16>
    %47 = vector.shape_cast %46 : vector<1x16x128xbf16> to vector<16x128xbf16>
    %cst_40 = arith.constant dense<0.000000e+00> : vector<64x128xf32>
    %48 = tpu.matmul %45, %47, %cst_40 {dimension_numbers = #tpu.dot_dimension_numbers<[1], [0], [0], [1], [0, 0, 1, 1], [], []>} : vector<64x16xbf16>, vector<16x128xbf16>, vector<64x128xf32> -> vector<64x128xf32>
    %49 = arith.addf %42, %48 : vector<64x128xf32>
    %50 = vector.extract_strided_slice %28 {offsets = [1, 0, 0], sizes = [8, 8, 16], strides = [1, 1, 1]} : vector<9x16x16xf32> to vector<8x8x16xf32>
    %51 = vector.shape_cast %50 : vector<8x8x16xf32> to vector<64x16xf32>
    %52 = arith.truncf %51 : vector<64x16xf32> to vector<64x16xbf16>
    %c3 = arith.constant 3 : index
    %c0_41 = arith.constant 0 : index
    %c0_42 = arith.constant 0 : index
    %53 = vector.load %arg12[%c3, %c0_41, %c0_42] : memref<4x16x128xbf16, #tpu.memory_space<vmem>>, vector<1x16x128xbf16>
    %54 = vector.shape_cast %53 : vector<1x16x128xbf16> to vector<16x128xbf16>
    %cst_43 = arith.constant dense<0.000000e+00> : vector<64x128xf32>
    %55 = tpu.matmul %52, %54, %cst_43 {dimension_numbers = #tpu.dot_dimension_numbers<[1], [0], [0], [1], [0, 0, 1, 1], [], []>} : vector<64x16xbf16>, vector<16x128xbf16>, vector<64x128xf32> -> vector<64x128xf32>
    %56 = arith.addf %49, %55 : vector<64x128xf32>
    %c0_44 = arith.constant 0 : index
    %c0_45 = arith.constant 0 : index
    %57 = vector.load %arg13[%c0_44, %c0_45] : memref<1x128xf32, #tpu.memory_space<vmem>>, vector<1x128xf32>
    %58 = vector.broadcast %57 : vector<1x128xf32> to vector<64x128xf32>
    %59 = arith.addf %56, %58 : vector<64x128xf32>
    %c0_46 = arith.constant 0 : index
    %c0_47 = arith.constant 0 : index
    %c0_48 = arith.constant 0 : index
    %60 = vector.load %arg14[%c0_46, %c0_47, %c0_48] : memref<1x64x128xf32, #tpu.memory_space<vmem>>, vector<1x64x128xf32>
    %61 = vector.shape_cast %60 : vector<1x64x128xf32> to vector<64x128xf32>
    %62 = vector.shape_cast %59 : vector<64x128xf32> to vector<1x64x128xf32>
    tpu.vector_store %arg14[%c0_46, %c0_47, %c0_48], %62 {strides = array<i32>} : memref<1x64x128xf32, #tpu.memory_space<vmem>>, vector<1x64x128xf32>,
    %c0_49 = arith.constant 0 : index
    %c0_50 = arith.constant 0 : index
    %63 = vector.load %arg2[%c0_49, %c0_50] : memref<1x16xf32, #tpu.memory_space<vmem>>, vector<1x16xf32>
    %64 = vector.shape_cast %63 : vector<1x16xf32> to vector<1x1x16xf32>
    %65 = vector.broadcast %64 : vector<1x1x16xf32> to vector<8x8x16xf32>
    %66 = arith.mulf %12, %65 : vector<8x8x16xf32>
    %c0_51 = arith.constant 0 : index
    %c0_52 = arith.constant 0 : index
    %67 = vector.load %arg3[%c0_51, %c0_52] : memref<1x16xf32, #tpu.memory_space<vmem>>, vector<1x16xf32>
    %68 = vector.shape_cast %67 : vector<1x16xf32> to vector<1x1x16xf32>
    %69 = vector.broadcast %68 : vector<1x1x16xf32> to vector<8x8x16xf32>
    %70 = arith.addf %66, %69 : vector<8x8x16xf32>
    %71 = arith.negf %70 : vector<8x8x16xf32>
    %72 = math.exp %71 : vector<8x8x16xf32>
    %cst_53 = arith.constant 1.000000e+00 : f32
    %73 = vector.broadcast %cst_53 : f32 to vector<8x8x16xf32>
    %74 = arith.addf %73, %72 : vector<8x8x16xf32>
    %75 = arith.divf %73, %74 : vector<8x8x16xf32>
    %76 = arith.mulf %70, %75 : vector<8x8x16xf32>
    %c1_54 = arith.constant 1 : index
    %c0_55 = arith.constant 0 : index
    %c0_56 = arith.constant 0 : index
    %77 = vector.load %arg15[%c1_54, %c0_55, %c0_56] : memref<9x16x16xf32, #tpu.memory_space<vmem>>, vector<8x8x16xf32>
    tpu.vector_store %arg15[%c1_54, %c0_55, %c0_56], %76 {strides = array<i32>} : memref<9x16x16xf32, #tpu.memory_space<vmem>>, vector<8x8x16xf32>,
    %c0_57 = arith.constant 0 : index
    %c0_58 = arith.constant 0 : index
    %c0_59 = arith.constant 0 : index
    %78 = vector.load %arg15[%c0_57, %c0_58, %c0_59] : memref<9x16x16xf32, #tpu.memory_space<vmem>>, vector<9x16x16xf32>
    %c1_i32_60 = arith.constant 1 : i32
    %79 = tpu.dynamic_rotate %78 by %c1_i32_60 dim 1 : vector<9x16x16xf32>, i32 -> vector<9x16x16xf32>
    %80 = vector.extract_strided_slice %79 {offsets = [0, 0, 0], sizes = [8, 8, 16], strides = [1, 1, 1]} : vector<9x16x16xf32> to vector<8x8x16xf32>
    %81 = vector.shape_cast %80 : vector<8x8x16xf32> to vector<64x16xf32>
    %82 = arith.truncf %81 : vector<64x16xf32> to vector<64x16xbf16>
    %c0_61 = arith.constant 0 : index
    %c0_62 = arith.constant 0 : index
    %c0_63 = arith.constant 0 : index
    %83 = vector.load %arg6[%c0_61, %c0_62, %c0_63] : memref<4x16x128xbf16, #tpu.memory_space<vmem>>, vector<1x16x128xbf16>
    %84 = vector.shape_cast %83 : vector<1x16x128xbf16> to vector<16x128xbf16>
    %cst_64 = arith.constant dense<0.000000e+00> : vector<64x128xf32>
    %85 = tpu.matmul %82, %84, %cst_64 {dimension_numbers = #tpu.dot_dimension_numbers<[1], [0], [0], [1], [0, 0, 1, 1], [], []>} : vector<64x16xbf16>, vector<16x128xbf16>, vector<64x128xf32> -> vector<64x128xf32>
    %86 = vector.extract_strided_slice %78 {offsets = [0, 0, 0], sizes = [8, 8, 16], strides = [1, 1, 1]} : vector<9x16x16xf32> to vector<8x8x16xf32>
    %87 = vector.shape_cast %86 : vector<8x8x16xf32> to vector<64x16xf32>
    %88 = arith.truncf %87 : vector<64x16xf32> to vector<64x16xbf16>
    %c1_65 = arith.constant 1 : index
    %c0_66 = arith.constant 0 : index
    %c0_67 = arith.constant 0 : index
    %89 = vector.load %arg6[%c1_65, %c0_66, %c0_67] : memref<4x16x128xbf16, #tpu.memory_space<vmem>>, vector<1x16x128xbf16>
    %90 = vector.shape_cast %89 : vector<1x16x128xbf16> to vector<16x128xbf16>
    %cst_68 = arith.constant dense<0.000000e+00> : vector<64x128xf32>
    %91 = tpu.matmul %88, %90, %cst_68 {dimension_numbers = #tpu.dot_dimension_numbers<[1], [0], [0], [1], [0, 0, 1, 1], [], []>} : vector<64x16xbf16>, vector<16x128xbf16>, vector<64x128xf32> -> vector<64x128xf32>
    %92 = arith.addf %85, %91 : vector<64x128xf32>
    %93 = vector.extract_strided_slice %79 {offsets = [1, 0, 0], sizes = [8, 8, 16], strides = [1, 1, 1]} : vector<9x16x16xf32> to vector<8x8x16xf32>
    %94 = vector.shape_cast %93 : vector<8x8x16xf32> to vector<64x16xf32>
    %95 = arith.truncf %94 : vector<64x16xf32> to vector<64x16xbf16>
    %c2_69 = arith.constant 2 : index
    %c0_70 = arith.constant 0 : index
    %c0_71 = arith.constant 0 : index
    %96 = vector.load %arg6[%c2_69, %c0_70, %c0_71] : memref<4x16x128xbf16, #tpu.memory_space<vmem>>, vector<1x16x128xbf16>
    %97 = vector.shape_cast %96 : vector<1x16x128xbf16> to vector<16x128xbf16>
    %cst_72 = arith.constant dense<0.000000e+00> : vector<64x128xf32>
    %98 = tpu.matmul %95, %97, %cst_72 {dimension_numbers = #tpu.dot_dimension_numbers<[1], [0], [0], [1], [0, 0, 1, 1], [], []>} : vector<64x16xbf16>, vector<16x128xbf16>, vector<64x128xf32> -> vector<64x128xf32>
    %99 = arith.addf %92, %98 : vector<64x128xf32>
    %100 = vector.extract_strided_slice %78 {offsets = [1, 0, 0], sizes = [8, 8, 16], strides = [1, 1, 1]} : vector<9x16x16xf32> to vector<8x8x16xf32>
    %101 = vector.shape_cast %100 : vector<8x8x16xf32> to vector<64x16xf32>
    %102 = arith.truncf %101 : vector<64x16xf32> to vector<64x16xbf16>
    %c3_73 = arith.constant 3 : index
    %c0_74 = arith.constant 0 : index
    %c0_75 = arith.constant 0 : index
    %103 = vector.load %arg6[%c3_73, %c0_74, %c0_75] : memref<4x16x128xbf16, #tpu.memory_space<vmem>>, vector<1x16x128xbf16>
    %104 = vector.shape_cast %103 : vector<1x16x128xbf16> to vector<16x128xbf16>
    %cst_76 = arith.constant dense<0.000000e+00> : vector<64x128xf32>
    %105 = tpu.matmul %102, %104, %cst_76 {dimension_numbers = #tpu.dot_dimension_numbers<[1], [0], [0], [1], [0, 0, 1, 1], [], []>} : vector<64x16xbf16>, vector<16x128xbf16>, vector<64x128xf32> -> vector<64x128xf32>
    %106 = arith.addf %99, %105 : vector<64x128xf32>
    %c0_77 = arith.constant 0 : index
    %c0_78 = arith.constant 0 : index
    %107 = vector.load %arg7[%c0_77, %c0_78] : memref<1x128xf32, #tpu.memory_space<vmem>>, vector<1x128xf32>
    %108 = vector.broadcast %107 : vector<1x128xf32> to vector<64x128xf32>
    %109 = arith.addf %106, %108 : vector<64x128xf32>
    %c0_79 = arith.constant 0 : index
    %c0_80 = arith.constant 0 : index
    %110 = vector.load %arg8[%c0_79, %c0_80] : memref<1x128xf32, #tpu.memory_space<vmem>>, vector<1x128xf32>
    %111 = vector.broadcast %110 : vector<1x128xf32> to vector<64x128xf32>
    %112 = arith.mulf %109, %111 : vector<64x128xf32>
    %c0_81 = arith.constant 0 : index
    %c0_82 = arith.constant 0 : index
    %113 = vector.load %arg9[%c0_81, %c0_82] : memref<1x128xf32, #tpu.memory_space<vmem>>, vector<1x128xf32>
    %114 = vector.broadcast %113 : vector<1x128xf32> to vector<64x128xf32>
    %115 = arith.addf %112, %114 : vector<64x128xf32>
    %116 = arith.negf %115 : vector<64x128xf32>
    %117 = math.exp %116 : vector<64x128xf32>
    %cst_83 = arith.constant 1.000000e+00 : f32
    %118 = vector.broadcast %cst_83 : f32 to vector<64x128xf32>
    %119 = arith.addf %118, %117 : vector<64x128xf32>
    %120 = arith.divf %118, %119 : vector<64x128xf32>
    %121 = arith.mulf %115, %120 : vector<64x128xf32>
    %122 = vector.shape_cast %121 : vector<64x128xf32> to vector<8x8x128xf32>
    %c1_84 = arith.constant 1 : index
    %c0_85 = arith.constant 0 : index
    %c0_86 = arith.constant 0 : index
    %123 = vector.load %arg16[%c1_84, %c0_85, %c0_86] : memref<10x16x128xf32, #tpu.memory_space<vmem>>, vector<8x8x128xf32>
    tpu.vector_store %arg16[%c1_84, %c0_85, %c0_86], %122 {strides = array<i32>} : memref<10x16x128xf32, #tpu.memory_space<vmem>>, vector<8x8x128xf32>,
    %c0_87 = arith.constant 0 : index
    %c0_88 = arith.constant 0 : index
    %c0_89 = arith.constant 0 : index
    %124 = vector.load %arg16[%c0_87, %c0_88, %c0_89] : memref<10x16x128xf32, #tpu.memory_space<vmem>>, vector<10x16x128xf32>
    %c1_i32_90 = arith.constant 1 : i32
    %125 = tpu.dynamic_rotate %124 by %c1_i32_90 dim 1 : vector<10x16x128xf32>, i32 -> vector<10x16x128xf32>
    %c15_i32 = arith.constant 15 : i32
    %126 = tpu.dynamic_rotate %124 by %c15_i32 dim 1 : vector<10x16x128xf32>, i32 -> vector<10x16x128xf32>
    %127 = vector.extract_strided_slice %125 {offsets = [0, 0, 0], sizes = [8, 8, 128], strides = [1, 1, 1]} : vector<10x16x128xf32> to vector<8x8x128xf32>
    %128 = vector.shape_cast %127 : vector<8x8x128xf32> to vector<64x128xf32>
    %129 = arith.truncf %128 : vector<64x128xf32> to vector<64x128xbf16>
    %c0_91 = arith.constant 0 : index
    %c0_92 = arith.constant 0 : index
    %c0_93 = arith.constant 0 : index
    %130 = vector.load %arg10[%c0_91, %c0_92, %c0_93] : memref<9x128x128xbf16, #tpu.memory_space<vmem>>, vector<1x128x128xbf16>
    %131 = vector.shape_cast %130 : vector<1x128x128xbf16> to vector<128x128xbf16>
    %cst_94 = arith.constant dense<0.000000e+00> : vector<64x128xf32>
    %132 = tpu.matmul %129, %131, %cst_94 {dimension_numbers = #tpu.dot_dimension_numbers<[1], [0], [0], [1], [0, 0, 1, 1], [], []>} : vector<64x128xbf16>, vector<128x128xbf16>, vector<64x128xf32> -> vector<64x128xf32>
    %133 = vector.extract_strided_slice %124 {offsets = [0, 0, 0], sizes = [8, 8, 128], strides = [1, 1, 1]} : vector<10x16x128xf32> to vector<8x8x128xf32>
    %134 = vector.shape_cast %133 : vector<8x8x128xf32> to vector<64x128xf32>
    %135 = arith.truncf %134 : vector<64x128xf32> to vector<64x128xbf16>
    %c1_95 = arith.constant 1 : index
    %c0_96 = arith.constant 0 : index
    %c0_97 = arith.constant 0 : index
    %136 = vector.load %arg10[%c1_95, %c0_96, %c0_97] : memref<9x128x128xbf16, #tpu.memory_space<vmem>>, vector<1x128x128xbf16>
    %137 = vector.shape_cast %136 : vector<1x128x128xbf16> to vector<128x128xbf16>
    %cst_98 = arith.constant dense<0.000000e+00> : vector<64x128xf32>
    %138 = tpu.matmul %135, %137, %cst_98 {dimension_numbers = #tpu.dot_dimension_numbers<[1], [0], [0], [1], [0, 0, 1, 1], [], []>} : vector<64x128xbf16>, vector<128x128xbf16>, vector<64x128xf32> -> vector<64x128xf32>
    %139 = arith.addf %132, %138 : vector<64x128xf32>
    %140 = vector.extract_strided_slice %126 {offsets = [0, 0, 0], sizes = [8, 8, 128], strides = [1, 1, 1]} : vector<10x16x128xf32> to vector<8x8x128xf32>
    %141 = vector.shape_cast %140 : vector<8x8x128xf32> to vector<64x128xf32>
    %142 = arith.truncf %141 : vector<64x128xf32> to vector<64x128xbf16>
    %c2_99 = arith.constant 2 : index
    %c0_100 = arith.constant 0 : index
    %c0_101 = arith.constant 0 : index
    %143 = vector.load %arg10[%c2_99, %c0_100, %c0_101] : memref<9x128x128xbf16, #tpu.memory_space<vmem>>, vector<1x128x128xbf16>
    %144 = vector.shape_cast %143 : vector<1x128x128xbf16> to vector<128x128xbf16>
    %cst_102 = arith.constant dense<0.000000e+00> : vector<64x128xf32>
    %145 = tpu.matmul %142, %144, %cst_102 {dimension_numbers = #tpu.dot_dimension_numbers<[1], [0], [0], [1], [0, 0, 1, 1], [], []>} : vector<64x128xbf16>, vector<128x128xbf16>, vector<64x128xf32> -> vector<64x128xf32>
    %146 = arith.addf %139, %145 : vector<64x128xf32>
    %147 = vector.extract_strided_slice %125 {offsets = [1, 0, 0], sizes = [8, 8, 128], strides = [1, 1, 1]} : vector<10x16x128xf32> to vector<8x8x128xf32>
    %148 = vector.shape_cast %147 : vector<8x8x128xf32> to vector<64x128xf32>
    %149 = arith.truncf %148 : vector<64x128xf32> to vector<64x128xbf16>
    %c3_103 = arith.constant 3 : index
    %c0_104 = arith.constant 0 : index
    %c0_105 = arith.constant 0 : index
    %150 = vector.load %arg10[%c3_103, %c0_104, %c0_105] : memref<9x128x128xbf16, #tpu.memory_space<vmem>>, vector<1x128x128xbf16>
    %151 = vector.shape_cast %150 : vector<1x128x128xbf16> to vector<128x128xbf16>
    %cst_106 = arith.constant dense<0.000000e+00> : vector<64x128xf32>
    %152 = tpu.matmul %149, %151, %cst_106 {dimension_numbers = #tpu.dot_dimension_numbers<[1], [0], [0], [1], [0, 0, 1, 1], [], []>} : vector<64x128xbf16>, vector<128x128xbf16>, vector<64x128xf32> -> vector<64x128xf32>
    %153 = arith.addf %146, %152 : vector<64x128xf32>
    %154 = vector.extract_strided_slice %124 {offsets = [1, 0, 0], sizes = [8, 8, 128], strides = [1, 1, 1]} : vector<10x16x128xf32> to vector<8x8x128xf32>
    %155 = vector.shape_cast %154 : vector<8x8x128xf32> to vector<64x128xf32>
    %156 = arith.truncf %155 : vector<64x128xf32> to vector<64x128xbf16>
    %c4 = arith.constant 4 : index
    %c0_107 = arith.constant 0 : index
    %c0_108 = arith.constant 0 : index
    %157 = vector.load %arg10[%c4, %c0_107, %c0_108] : memref<9x128x128xbf16, #tpu.memory_space<vmem>>, vector<1x128x128xbf16>
    %158 = vector.shape_cast %157 : vector<1x128x128xbf16> to vector<128x128xbf16>
    %cst_109 = arith.constant dense<0.000000e+00> : vector<64x128xf32>
    %159 = tpu.matmul %156, %158, %cst_109 {dimension_numbers = #tpu.dot_dimension_numbers<[1], [0], [0], [1], [0, 0, 1, 1], [], []>} : vector<64x128xbf16>, vector<128x128xbf16>, vector<64x128xf32> -> vector<64x128xf32>
    %160 = arith.addf %153, %159 : vector<64x128xf32>
    %161 = vector.extract_strided_slice %126 {offsets = [1, 0, 0], sizes = [8, 8, 128], strides = [1, 1, 1]} : vector<10x16x128xf32> to vector<8x8x128xf32>
    %162 = vector.shape_cast %161 : vector<8x8x128xf32> to vector<64x128xf32>
    %163 = arith.truncf %162 : vector<64x128xf32> to vector<64x128xbf16>
    %c5 = arith.constant 5 : index
    %c0_110 = arith.constant 0 : index
    %c0_111 = arith.constant 0 : index
    %164 = vector.load %arg10[%c5, %c0_110, %c0_111] : memref<9x128x128xbf16, #tpu.memory_space<vmem>>, vector<1x128x128xbf16>
    %165 = vector.shape_cast %164 : vector<1x128x128xbf16> to vector<128x128xbf16>
    %cst_112 = arith.constant dense<0.000000e+00> : vector<64x128xf32>
    %166 = tpu.matmul %163, %165, %cst_112 {dimension_numbers = #tpu.dot_dimension_numbers<[1], [0], [0], [1], [0, 0, 1, 1], [], []>} : vector<64x128xbf16>, vector<128x128xbf16>, vector<64x128xf32> -> vector<64x128xf32>
    %167 = arith.addf %160, %166 : vector<64x128xf32>
    %168 = vector.extract_strided_slice %125 {offsets = [2, 0, 0], sizes = [8, 8, 128], strides = [1, 1, 1]} : vector<10x16x128xf32> to vector<8x8x128xf32>
    %169 = vector.shape_cast %168 : vector<8x8x128xf32> to vector<64x128xf32>
    %170 = arith.truncf %169 : vector<64x128xf32> to vector<64x128xbf16>
    %c6 = arith.constant 6 : index
    %c0_113 = arith.constant 0 : index
    %c0_114 = arith.constant 0 : index
    %171 = vector.load %arg10[%c6, %c0_113, %c0_114] : memref<9x128x128xbf16, #tpu.memory_space<vmem>>, vector<1x128x128xbf16>
    %172 = vector.shape_cast %171 : vector<1x128x128xbf16> to vector<128x128xbf16>
    %cst_115 = arith.constant dense<0.000000e+00> : vector<64x128xf32>
    %173 = tpu.matmul %170, %172, %cst_115 {dimension_numbers = #tpu.dot_dimension_numbers<[1], [0], [0], [1], [0, 0, 1, 1], [], []>} : vector<64x128xbf16>, vector<128x128xbf16>, vector<64x128xf32> -> vector<64x128xf32>
    %174 = arith.addf %167, %173 : vector<64x128xf32>
    %175 = vector.extract_strided_slice %124 {offsets = [2, 0, 0], sizes = [8, 8, 128], strides = [1, 1, 1]} : vector<10x16x128xf32> to vector<8x8x128xf32>
    %176 = vector.shape_cast %175 : vector<8x8x128xf32> to vector<64x128xf32>
    %177 = arith.truncf %176 : vector<64x128xf32> to vector<64x128xbf16>
    %c7 = arith.constant 7 : index
    %c0_116 = arith.constant 0 : index
    %c0_117 = arith.constant 0 : index
    %178 = vector.load %arg10[%c7, %c0_116, %c0_117] : memref<9x128x128xbf16, #tpu.memory_space<vmem>>, vector<1x128x128xbf16>
    %179 = vector.shape_cast %178 : vector<1x128x128xbf16> to vector<128x128xbf16>
    %cst_118 = arith.constant dense<0.000000e+00> : vector<64x128xf32>
    %180 = tpu.matmul %177, %179, %cst_118 {dimension_numbers = #tpu.dot_dimension_numbers<[1], [0], [0], [1], [0, 0, 1, 1], [], []>} : vector<64x128xbf16>, vector<128x128xbf16>, vector<64x128xf32> -> vector<64x128xf32>
    %181 = arith.addf %174, %180 : vector<64x128xf32>
    %182 = vector.extract_strided_slice %126 {offsets = [2, 0, 0], sizes = [8, 8, 128], strides = [1, 1, 1]} : vector<10x16x128xf32> to vector<8x8x128xf32>
    %183 = vector.shape_cast %182 : vector<8x8x128xf32> to vector<64x128xf32>
    %184 = arith.truncf %183 : vector<64x128xf32> to vector<64x128xbf16>
    %c8_119 = arith.constant 8 : index
    %c0_120 = arith.constant 0 : index
    %c0_121 = arith.constant 0 : index
    %185 = vector.load %arg10[%c8_119, %c0_120, %c0_121] : memref<9x128x128xbf16, #tpu.memory_space<vmem>>, vector<1x128x128xbf16>
    %186 = vector.shape_cast %185 : vector<1x128x128xbf16> to vector<128x128xbf16>
    %cst_122 = arith.constant dense<0.000000e+00> : vector<64x128xf32>
    %187 = tpu.matmul %184, %186, %cst_122 {dimension_numbers = #tpu.dot_dimension_numbers<[1], [0], [0], [1], [0, 0, 1, 1], [], []>} : vector<64x128xbf16>, vector<128x128xbf16>, vector<64x128xf32> -> vector<64x128xf32>
    %188 = arith.addf %181, %187 : vector<64x128xf32>
    %c0_123 = arith.constant 0 : index
    %c0_124 = arith.constant 0 : index
    %c0_125 = arith.constant 0 : index
    %189 = vector.load %arg14[%c0_123, %c0_124, %c0_125] : memref<1x64x128xf32, #tpu.memory_space<vmem>>, vector<1x64x128xf32>
    %190 = vector.shape_cast %189 : vector<1x64x128xf32> to vector<64x128xf32>
    %191 = arith.addf %190, %188 : vector<64x128xf32>
    %c0_126 = arith.constant 0 : index
    %c0_127 = arith.constant 0 : index
    %192 = vector.load %arg11[%c0_126, %c0_127] : memref<1x128xf32, #tpu.memory_space<vmem>>, vector<1x128xf32>
    %193 = vector.broadcast %192 : vector<1x128xf32> to vector<64x128xf32>
    %194 = arith.addf %191, %193 : vector<64x128xf32>
    %c0_128 = arith.constant 0 : index
    %c0_129 = arith.constant 0 : index
    %c0_130 = arith.constant 0 : index
    %195 = vector.load %arg14[%c0_128, %c0_129, %c0_130] : memref<1x64x128xf32, #tpu.memory_space<vmem>>, vector<1x64x128xf32>
    %196 = vector.shape_cast %195 : vector<1x64x128xf32> to vector<64x128xf32>
    %197 = vector.shape_cast %194 : vector<64x128xf32> to vector<1x64x128xf32>
    tpu.vector_store %arg14[%c0_128, %c0_129, %c0_130], %197 {strides = array<i32>} : memref<1x64x128xf32, #tpu.memory_space<vmem>>, vector<1x64x128xf32>,
    return
  }
  func.func @transform_0(%arg0: i32) -> (i32, i32, i32, i32) {
    %c0_i32 = arith.constant 0 : i32
    %c0_i32_0 = arith.constant 0 : i32
    %c0_i32_1 = arith.constant 0 : i32
    %c0_i32_2 = arith.constant 0 : i32
    return %arg0, %c0_i32, %c0_i32_0, %c0_i32_1 : i32, i32, i32, i32
  }
  func.func @transform_1(%arg0: i32) -> (i32, i32) {
    %c0_i32 = arith.constant 0 : i32
    %c0_i32_0 = arith.constant 0 : i32
    %c0_i32_1 = arith.constant 0 : i32
    return %c0_i32, %c0_i32_0 : i32, i32
  }
  func.func @transform_2(%arg0: i32) -> (i32, i32) {
    %c0_i32 = arith.constant 0 : i32
    %c0_i32_0 = arith.constant 0 : i32
    %c0_i32_1 = arith.constant 0 : i32
    return %c0_i32, %c0_i32_0 : i32, i32
  }
  func.func @transform_3(%arg0: i32) -> (i32, i32) {
    %c0_i32 = arith.constant 0 : i32
    %c0_i32_0 = arith.constant 0 : i32
    %c0_i32_1 = arith.constant 0 : i32
    return %c0_i32, %c0_i32_0 : i32, i32
  }
  func.func @transform_4(%arg0: i32) -> (i32, i32) {
    %c0_i32 = arith.constant 0 : i32
    %c0_i32_0 = arith.constant 0 : i32
    %c0_i32_1 = arith.constant 0 : i32
    return %c0_i32, %c0_i32_0 : i32, i32
  }
  func.func @transform_5(%arg0: i32) -> (i32, i32, i32) {
    %c0_i32 = arith.constant 0 : i32
    %c0_i32_0 = arith.constant 0 : i32
    %c0_i32_1 = arith.constant 0 : i32
    %c0_i32_2 = arith.constant 0 : i32
    return %c0_i32, %c0_i32_0, %c0_i32_1 : i32, i32, i32
  }
  func.func @transform_6(%arg0: i32) -> (i32, i32) {
    %c0_i32 = arith.constant 0 : i32
    %c0_i32_0 = arith.constant 0 : i32
    %c0_i32_1 = arith.constant 0 : i32
    return %c0_i32, %c0_i32_0 : i32, i32
  }
  func.func @transform_7(%arg0: i32) -> (i32, i32) {
    %c0_i32 = arith.constant 0 : i32
    %c0_i32_0 = arith.constant 0 : i32
    %c0_i32_1 = arith.constant 0 : i32
    return %c0_i32, %c0_i32_0 : i32, i32
  }
  func.func @transform_8(%arg0: i32) -> (i32, i32) {
    %c0_i32 = arith.constant 0 : i32
    %c0_i32_0 = arith.constant 0 : i32
    %c0_i32_1 = arith.constant 0 : i32
    return %c0_i32, %c0_i32_0 : i32, i32
  }
  func.func @transform_9(%arg0: i32) -> (i32, i32, i32) {
    %c0_i32 = arith.constant 0 : i32
    %c0_i32_0 = arith.constant 0 : i32
    %c0_i32_1 = arith.constant 0 : i32
    %c0_i32_2 = arith.constant 0 : i32
    return %c0_i32, %c0_i32_0, %c0_i32_1 : i32, i32, i32
  }
  func.func @transform_10(%arg0: i32) -> (i32, i32) {
    %c0_i32 = arith.constant 0 : i32
    %c0_i32_0 = arith.constant 0 : i32
    %c0_i32_1 = arith.constant 0 : i32
    return %c0_i32, %c0_i32_0 : i32, i32
  }
  func.func @transform_11(%arg0: i32) -> (i32, i32, i32) {
    %c0_i32 = arith.constant 0 : i32
    %c0_i32_0 = arith.constant 0 : i32
    %c0_i32_1 = arith.constant 0 : i32
    %c0_i32_2 = arith.constant 0 : i32
    return %c0_i32, %c0_i32_0, %c0_i32_1 : i32, i32, i32
  }
  func.func @transform_12(%arg0: i32) -> (i32, i32) {
    %c0_i32 = arith.constant 0 : i32
    %c0_i32_0 = arith.constant 0 : i32
    %c0_i32_1 = arith.constant 0 : i32
    return %c0_i32, %c0_i32_0 : i32, i32
  }
  func.func @transform_13(%arg0: i32) -> (i32, i32, i32) {
    %c0_i32 = arith.constant 0 : i32
    %c0_i32_0 = arith.constant 0 : i32
    %c0_i32_1 = arith.constant 0 : i32
    return %arg0, %c0_i32, %c0_i32_0 : i32, i32, i32
  }
}

</mosaic_0001>

<bundles_post_ra>
// kernel: tile.38
= control target key start
LH: loop header
LB: loop body
LE: loop exit
PB: predicated region body
PF: predicated region fallthrough
CT: control target
= control target key end

     0   :  { %s22_s0 = inlined_call_operand.vmem [shape: f32[4], index: 0, kind: input, shape index: {}]   ;;  %s23_s1 = inlined_call_operand.vmem [shape: f32[4,4], index: 1, kind: output, shape index: {}]  }
   0x1   :  { %v4_v0 = vld [vmem:[%s22_s0] ss:$0 sm:$0xff] }
   0x2   :  { %5 = vst [vmem:[%s23_s1] sm:$0xf] %v4_v0 }

// kernel: tile.39
= control target key start
LH: loop header
LB: loop body
LE: loop exit
PB: predicated region body
PF: predicated region fallthrough
CT: control target
= control target key end

     0   :  { %vm7_vm0 = vcmask 31744   ;;  %s37_s8 = smov 4   ;;  %s38_s9 = smov 8   ;;  %vm13_vm1 = vcmask 130144   ;;  %vm19_vm2 = vcmask 97344   ;;  %vm25_vm3 = vcmask 64544   ;;  %s55_s0 = inlined_call_operand.vmem [shape: f32[4,4], index: 0, kind: input, shape index: {}]   ;;  %s56_s1 = inlined_call_operand.vmem [shape: f32[1,16], index: 1, kind: output, shape index: {}]  }
   0x1   :  { %v4_v0 = vld [vmem:[%s55_s0] sm:$0xf]  ;;  %s36_s0 = smov 12  }
   0x2   :  { %5 = vst [vmem:[#allocation1] sm:$0xf] %v4_v0 }
   0x9   :  { %v10_v1 = vld [vmem:[#allocation1 + $0x3] sm:$0x1]   ;;  %v22_v2 = vld [vmem:[#allocation1 + $0x1] sm:$0x1]   ;;  %v6_v3 = vld [vmem:[#allocation1] sm:$0x1]  }
   0xa   :  { %11 = vrot.lane.b32.xlu0 %v10_v1, %s36_s0  ;;  %23 = vrot.lane.b32.xlu1 %v22_v2, %s37_s8  ;;  %v16_v4 = vld [vmem:[#allocation1 + $0x2] sm:$0x1]   ;;  %8 = vst.msk [vmem:[#allocation0] sm:$0x1] %vm7_vm0, %v6_v3  }
   0xe   :  { %17 = vrot.lane.b32.xlu0 %v16_v4, %s38_s9 }
  0x7c   :  { %v12_v5 = vpop.permute.xlu0 %11   ;;  %v24_v6 = vpop.permute.xlu1 %23  }
  0x7d   :  { %14 = vst.msk [vmem:[#allocation0] sm:$0x1] %vm13_vm1, %v12_v5  }
  0x80   :  { %v18_v7 = vpop.permute.xlu0 %17  }
  0x81   :  { %20 = vst.msk [vmem:[#allocation0] sm:$0x1] %vm19_vm2, %v18_v7  }
  0x82   :  { %26 = vst.msk [vmem:[#allocation0] sm:$0x1] %vm25_vm3, %v24_v6  }
  0x89   :  { %v30_v8 = vld [vmem:[#allocation0] sm:$0x1] }
  0x8a   :  { %32 = vst [vmem:[%s56_s1] sm:$0x1] %v30_v8 }

// kernel: resnet_downscale_block.1
= control target key start
LH: loop header
LB: loop body
LE: loop exit
PB: predicated region body
PF: predicated region fallthrough
CT: control target
= control target key end

     0   :  { %s4262_s25 = smov 0   ;;  %s5165_s0 = inlined_call_operand.vmem [shape: bf16[2,8,8,16], index: 0, kind: input, shape index: {}]   ;;  %s5166_s1 = inlined_call_operand.vmem [shape: f32[1,16], index: 1, kind: input, shape index: {}]   ;;  %s5167_s2 = inlined_call_operand.vmem [shape: f32[1,16], index: 2, kind: input, shape index: {}]   ;;  %s5168_s3 = inlined_call_operand.vmem [shape: f32[1,16], index: 3, kind: input, shape index: {}]   ;;  %s5169_s4 = inlined_call_operand.vmem [shape: f32[1,16], index: 4, kind: input, shape index: {}]   ;;  %s5170_s5 = inlined_call_operand.vmem [shape: bf16[4,16,128], index: 5, kind: input, shape index: {}]   ;;  %s5171_s6 = inlined_call_operand.vmem [shape: f32[1,128], index: 6, kind: input, shape index: {}]   ;;  %s5172_s7 = inlined_call_operand.vmem [shape: f32[1,128], index: 7, kind: input, shape index: {}]   ;;  %s5173_s8 = inlined_call_operand.vmem [shape: f32[1,128], index: 8, kind: input, shape index: {}]   ;;  %s5174_s9 = inlined_call_operand.vmem [shape: bf16[9,128,128], index: 9, kind: input, shape index: {}]   ;;  %s5175_s10 = inlined_call_operand.vmem [shape: f32[1,128], index: 10, kind: input, shape index: {}]   ;;  %s5176_s11 = inlined_call_operand.vmem [shape: bf16[4,16,128], index: 11, kind: input, shape index: {}]   ;;  %s5177_s12 = inlined_call_operand.vmem [shape: f32[1,128], index: 12, kind: input, shape index: {}]   ;;  %s5178_s13 = inlined_call_operand.vmem [shape: f32[2,64,128], index: 13, kind: output, shape index: {}]  }
   0x1 LB: > { %s3077_s26 = sadd.s32 4294967295, %s4189_s25   ;;  %p3081_p0 = scmp.ge.s32.totalorder %s4189_s25, 1  ;;  %s4189_s25 = sphi %s4262_s25, %s23_s25  }
   0x2   : > { %p387_p1 = scmp.lt.s32.totalorder %s4189_s25, 3 }
   0x4   : > { %p388_p2 = pnand %p3081_p0, %p387_p1 }
   0x5   : > { %v4007_v0 = vld [vmem:[%s5176_s11 + $0x8] sm:$0xff] (!%p388_p2)   ;;  %p431_p3 = scmp.lt.s32.totalorder (!%p388_p2), %s3077_s26, 1  ;;  %vm442_vm0 = vcmask (!%p388_p2), 130048   ;;  %v4191_v1 = vmov (!%p388_p2), 0.0   ;;  %v4008_v2 = vld [vmem:[%s5176_s11] sm:$0xff] (!%p388_p2)   ;;  %v4317_v5 = vld [vmem:[%s5176_s11 + $0x10] sm:$0xff] (!%p388_p2)  }
   0x6   : > { %391 = sbr.rel (%p388_p2) target bundleno = 737 (0x2e1), region = 72  ;;  %3542 = vmatprep.subr.bf16.mxu1 (!%p388_p2), %v4007_v0  ;;  %443 = vst.msk [vmem:[#allocation2] sm:$0xff] (!%p388_p2), %vm442_vm0, %v4191_v1  ;;  %444 = vst.msk [vmem:[#allocation2 + $0x8] sm:$0xff] (!%p388_p2), %vm442_vm0, %v4191_v1  ;;  %v4304_v3 = vld [vmem:[%s5168_s3] ss:$0 sm:$0xff] (!%p388_p2)  ;;  %3552 = vmatprep.subr.bf16.mxu0 (!%p388_p2), %v4008_v2  ;;  %v4309_v4 = vld [vmem:[%s5170_s5 + $0x8] sm:$0xff] (!%p388_p2)  }
   0x7   : > { %446 = vst.msk [vmem:[#allocation2 + $0x18] sm:$0xff] (!%p388_p2), %vm442_vm0, %v4191_v1  ;;  %447 = vst.msk [vmem:[#allocation2 + $0x28] sm:$0xff] (!%p388_p2), %vm442_vm0, %v4191_v1  ;;  %3543 = vmatpush3.bf16.msra.mxu1 (!%p388_p2), %v4007_v0  ;;  %3553 = vmatpush3.bf16.msra.mxu0 (!%p388_p2), %v4008_v2  ;;  %v4322_v7 = vld [vmem:[%s5166_s1] ss:$0 sm:$0xff] (!%p388_p2) }
   0x8   : > { %448 = vst.msk [vmem:[#allocation2 + $0x38] sm:$0xff] (!%p388_p2), %vm442_vm0, %v4191_v1  ;;  %449 = vst.msk [vmem:[#allocation2 + $0x48] sm:$0xff] (!%p388_p2), %vm442_vm0, %v4191_v1  ;;  %3582 = vmatprep.subr.bf16.mxu1 (!%p388_p2), %v4309_v4  ;;  %v4328_v11 = vld [vmem:[%s5169_s4] ss:$0 sm:$0xff] (!%p388_p2)  ;;  %3562 = vmatprep.subr.bf16.mxu0 (!%p388_p2), %v4317_v5 }
   0x9   : > { %450 = vst.msk [vmem:[#allocation2 + $0x58] sm:$0xff] (!%p388_p2), %vm442_vm0, %v4191_v1  ;;  %451 = vst.msk [vmem:[#allocation2 + $0x68] sm:$0xff] (!%p388_p2), %vm442_vm0, %v4191_v1  ;;  %v4334_v13 = vld [vmem:[%s5167_s2] ss:$0 sm:$0xff] (!%p388_p2) }
   0xa   : > { %452 = vst.msk [vmem:[#allocation2 + $0x78] sm:$0xff] (!%p388_p2), %vm442_vm0, %v4191_v1  ;;  %453 = vst.msk [vmem:[#allocation2 + $0x88] sm:$0xff] (!%p388_p2), %vm442_vm0, %v4191_v1 }
   0xb   : > { %445 = vst.msk [vmem:[#allocation2 + $0x8] sm:$0xff] (!%p388_p2), %vm442_vm0, %v4191_v1 }
   0xd   : > { %s5180_s26 = smov (!%p431_p3, %s3077_s26), 1 }
   0xe   : > { %s3373_s14 = sshll.u32 %s5180_s26, 5 }
   0xf   : > { %s435_s21 = scalar_lea.vmem %s5165_s0, %s3373_s14  ;;  %s3374_s14 = sshll.u32 %s5180_s26, 6 }
  0x10   : > { %v3376_v6 = vld [vmem:[%s435_s21] sm:$0xff]   ;;  %v3391_v8 = vld [vmem:[%s435_s21 + $0x8] sm:$0xff]   ;;  %v3392_v19 = vld [vmem:[%s435_s21 + $0x10] sm:$0xff]   ;;  %s4745_s19 = scalar_lea.vmem %s5178_s13, %s3374_s14 }
  0x11   : > { %v3377_v9 = vunpack.c.l.bf16 %v3376_v6  ;;  %v3378_v10 = vunpack.c.h.bf16 %v3376_v6  ;;  %v3381_v12 = vunpack.c.l.bf16 %v3391_v8  ;;  %v3382_v14 = vunpack.c.h.bf16 %v3391_v8  ;;  %v3393_v27 = vld [vmem:[%s435_s21 + $0x18] sm:$0xff]  }
  0x12   : > { %v3385_v31 = vunpack.c.l.bf16 %v3392_v19  ;;  %v3386_v38 = vunpack.c.h.bf16 %v3392_v19  ;;  %v3389_v39 = vunpack.c.l.bf16 %v3393_v27  ;;  %v3390_v43 = vunpack.c.h.bf16 %v3393_v27 }
  0x13   : > { %v492_v15 = vmul.f32 %v3377_v9, %v4304_v3  ;;  %v1033_v16 = vmul.f32 %v3377_v9, %v4322_v7  ;;  %v1034_v17 = vmul.f32 %v3378_v10, %v4322_v7  ;;  %v493_v18 = vmul.f32 %v3378_v10, %v4304_v3 }
  0x14   : > { %v494_v20 = vmul.f32 %v3381_v12, %v4304_v3  ;;  %v1035_v21 = vmul.f32 %v3381_v12, %v4322_v7  ;;  %v1036_v22 = vmul.f32 %v3382_v14, %v4322_v7  ;;  %v495_v30 = vmul.f32 %v3382_v14, %v4304_v3 }
  0x15   : > { %v4344_v23 = vadd.f32 %v4328_v11, %v492_v15  ;;  %v4347_v24 = vadd.f32 %v4334_v13, %v1033_v16  ;;  %v4350_v25 = vadd.f32 %v4328_v11, %v493_v18  ;;  %v4353_v26 = vadd.f32 %v4334_v13, %v1034_v17 }
  0x16   : > { %v4356_v28 = vadd.f32 %v4328_v11, %v494_v20  ;;  %v4359_v29 = vadd.f32 %v4334_v13, %v1035_v21  ;;  %v4366_v35 = vadd.f32 %v4334_v13, %v1036_v22  ;;  %v4370_v37 = vadd.f32 %v4328_v11, %v495_v30 }
  0x17   : > { %v3088_v32 = vmul.f32 -1.442695, %v4344_v23  ;;  %v3125_v33 = vmul.f32 -1.442695, %v4347_v24  ;;  %v3089_v34 = vmul.f32 -1.442695, %v4350_v25  ;;  %v496_v45 = vmul.f32 %v3385_v31, %v4304_v3 }
  0x18   : > { %v3090_v36 = vmul.f32 -1.442695, %v4356_v28  ;;  %v3126_v40 = vmul.f32 -1.442695, %v4353_v26  ;;  %v3127_v41 = vmul.f32 -1.442695, %v4359_v29  ;;  %v1037_v46 = vmul.f32 %v3385_v31, %v4322_v7 }
  0x19   : > { %4087 = vpow2.f32 %v3088_v32  ;;  %v3091_v42 = vmul.f32 -1.442695, %v4370_v37  ;;  %v3128_v44 = vmul.f32 -1.442695, %v4366_v35  ;;  %v497_v47 = vmul.f32 %v3386_v38, %v4304_v3  ;;  %v4418_v32 = vld [vmem:[#allocation2] sm:$0xff] }
  0x1a   : > { %4089 = vpow2.f32 %v3125_v33  ;;  %v498_v48 = vmul.f32 %v3389_v39, %v4304_v3  ;;  %v1038_v49 = vmul.f32 %v3386_v38, %v4322_v7  ;;  %v4382_v50 = vadd.f32 %v4328_v11, %v496_v45 }
  0x1b   : > { %4091 = vpow2.f32 %v3089_v34  ;;  %v4385_v51 = vadd.f32 %v4334_v13, %v1037_v46  ;;  %v1039_v52 = vmul.f32 %v3389_v39, %v4322_v7  ;;  %v4389_v53 = vadd.f32 %v4328_v11, %v497_v47 }
  0x1c   : > { %4093 = vpow2.f32 %v3090_v36  ;;  %v4392_v54 = vadd.f32 %v4328_v11, %v498_v48  ;;  %v4395_v55 = vadd.f32 %v4334_v13, %v1038_v49  ;;  %v3092_v56 = vmul.f32 -1.442695, %v4382_v50  ;;  %v581_v36 = vld [vmem:[#allocation2 + $0x8] sm:$0xff] }
  0x1d   : > { %4095 = vpow2.f32 %v3126_v40  ;;  %v3129_v57 = vmul.f32 -1.442695, %v4385_v51  ;;  %v4400_v58 = vadd.f32 %v4334_v13, %v1039_v52  ;;  %v3093_v59 = vmul.f32 -1.442695, %v4389_v53  ;;  %v4420_v40 = vld [vmem:[#allocation2 + $0x18] sm:$0xff] }
  0x1e   : > { %4097 = vpow2.f32 %v3127_v41  ;;  %v3094_v60 = vmul.f32 -1.442695, %v4392_v54  ;;  %v3130_v61 = vmul.f32 -1.442695, %v4395_v55  ;;  %v499_v63 = vmul.f32 %v3390_v43, %v4304_v3 }
  0x1f   : > { %4099 = vpow2.f32 %v3091_v42  ;;  %v3131_v62 = vmul.f32 -1.442695, %v4400_v58  ;;  %v1040_v2 = vmul.f32 %v3390_v43, %v4322_v7  ;;  %v616_v3 = vlaneseq }
  0x20   : > { %4101 = vpow2.f32 %v3128_v44  ;;  %v4409_v9 = vadd.f32 %v4328_v11, %v499_v63  ;;  %v598_v43 = vrot.slane %v4418_v32, 7  ;;  %v607_v46 = vrot.slane %v581_v36, 7  ;;  %v4478_v36 = vld [vmem:[#allocation2 + $0x58] sm:$0xff] }
  0x21   : > { %4103 = vpow2.f32 %v3092_v56  ;;  %v4412_v14 = vadd.f32 %v4334_v13, %v1040_v2  ;;  %v4416_v30 = vshrl.u32 %v616_v3, 7  ;;  %v608_v49 = vrot.slane %v4420_v40, 7 }
  0x22   : > { %4105 = vpow2.f32 %v3129_v57  ;;  %v3095_v17 = vmul.f32 -1.442695, %v4409_v9 }
  0x23   : > { %v4088_v0 = vpop.eup %4087  ;;  %4107 = vpow2.f32 %v3093_v59  ;;  %v3132_v19 = vmul.f32 -1.442695, %v4412_v14  ;;  %vm618_vm1 = vcmp.lt.s32.totalorder %v4416_v30, 1  ;;  %vm1720_vm2 = vcmp.lt.s32.totalorder %v4416_v30, 7  ;;  %v4041_v30 = vld [vmem:[%s5174_s9 + $0x28] sm:$0xff]  }
  0x24   : > { %v4090_v6 = vpop.eup %4089  ;;  %v539_v8 = vadd.f32 1.0, %v4088_v0  ;;  %4109 = vpow2.f32 %v3094_v60 }
  0x25   : > { %v4092_v10 = vpop.eup %4091  ;;  %v1080_v12 = vadd.f32 1.0, %v4090_v6  ;;  %4111 = vpow2.f32 %v3130_v61  ;;  %v4430_v6 = vld [vmem:[#allocation2 + $0x28] sm:$0xff] }
  0x26   : > { %v4094_v15 = vpop.eup %4093  ;;  %4113 = vrcp.f32 %v539_v8  ;;  %v540_v16 = vadd.f32 1.0, %v4092_v10 }
  0x27   : > { %v4096_v18 = vpop.eup %4095  ;;  %4115 = vrcp.f32 %v1080_v12  ;;  %v541_v7 = vadd.f32 1.0, %v4094_v15 }
  0x28   : > { %v4098_v20 = vpop.eup %4097  ;;  %4117 = vrcp.f32 %v540_v16  ;;  %v1081_v11 = vadd.f32 1.0, %v4096_v18 }
  0x29   : > { %v4100_v21 = vpop.eup %4099  ;;  %4119 = vrcp.f32 %v541_v7  ;;  %v1082_v22 = vadd.f32 1.0, %v4098_v20  ;;  %v609_v7 = vrot.slane %v4430_v6, 7 }
  0x2a   : > { %v4102_v27 = vpop.eup %4101  ;;  %4121 = vrcp.f32 %v1081_v11  ;;  %v542_v13 = vadd.f32 1.0, %v4100_v21 }
  0x2b   : > { %v4104_v31 = vpop.eup %4103  ;;  %4123 = vrcp.f32 %v1082_v22  ;;  %v1083_v33 = vadd.f32 1.0, %v4102_v27  ;;  %v4463_v27 = vld [vmem:[%s5170_s5] sm:$0xff]  }
  0x2c   : > { %v4106_v34 = vpop.eup %4105  ;;  %4125 = vrcp.f32 %v542_v13  ;;  %v543_v38 = vadd.f32 1.0, %v4104_v31 }
  0x2d   : > { %v4108_v39 = vpop.eup %4107  ;;  %4127 = vrcp.f32 %v1083_v33  ;;  %v1084_v41 = vadd.f32 1.0, %v4106_v34 }
  0x2e   : > { %v4110_v42 = vpop.eup %4109  ;;  %4129 = vrcp.f32 %v543_v38  ;;  %v544_v44 = vadd.f32 1.0, %v4108_v39 }
  0x2f   : > { %v4112_v45 = vpop.eup %4111  ;;  %4131 = vrcp.f32 %v1084_v41  ;;  %v545_v47 = vadd.f32 1.0, %v4110_v42 }
  0x30   : > { %v4114_v48 = vpop.eup %4113  ;;  %4133 = vrcp.f32 %v544_v44  ;;  %v1085_v52 = vadd.f32 1.0, %v4112_v45 }
  0x31   : > { %v4116_v56 = vpop.eup %4115  ;;  %v563_v57 = vmul.f32 %v4114_v48, %v4344_v23  ;;  %4135 = vrcp.f32 %v545_v47  ;;  %v4495_v47 = vld [vmem:[#allocation2 + $0x78] sm:$0xff] }
  0x32   : > { %v4118_v59 = vpop.eup %4117  ;;  %4137 = vpow2.f32 %v3131_v62  ;;  %v1104_v8 = vmul.f32 %v4116_v56, %v4347_v24 }
  0x33   : > { %v4120_v60 = vpop.eup %4119  ;;  %572 = vst.msk [vmem:[#allocation2 + $0x10] sm:$0xff] %vm442_vm0, %v563_v57  ;;  %v564_v61 = vmul.f32 %v4118_v59, %v4350_v25  ;;  %4139 = vrcp.f32 %v1085_v52  ;;  %v4435_v25 = vld [vmem:[#allocation2 + $0x38] sm:$0xff]  ;;  %v612_v59 = vrot.slane %v4478_v36, 7 }
  0x34   : > { %v4122_v63 = vpop.eup %4121  ;;  %v565_v0 = vmul.f32 %v4120_v60, %v4356_v28  ;;  %4141 = vpow2.f32 %v3095_v17  ;;  %v610_v21 = vrot.slane %v4435_v25, 7  ;;  %v4500_v52 = vld [vmem:[%s5176_s11 + $0x18] sm:$0xff]  }
  0x35   : > { %v4124_v2 = vpop.eup %4123  ;;  %573 = vst.msk [vmem:[#allocation2 + $0x20] sm:$0xff] %vm442_vm0, %v564_v61  ;;  %4143 = vpow2.f32 %v3132_v19  ;;  %v1105_v28 = vmul.f32 %v4122_v63, %v4353_v26  ;;  %v4447_v19 = vld [vmem:[#allocation2 + $0x48] sm:$0xff] }
  0x36   : > { %v4126_v23 = vpop.eup %4125  ;;  %574 = vst.msk [vmem:[#allocation2 + $0x30] sm:$0xff] %vm442_vm0, %v565_v0  ;;  %v1106_v18 = vmul.f32 %v4124_v2, %v4359_v29  ;;  %v611_v42 = vrot.slane %v4447_v19, 7  ;;  %v4014_v19 = vld [vmem:[%s5170_s5 + $0x18] sm:$0xff]  }
  0x37   : > { %v4128_v62 = vpop.eup %4127  ;;  %v566_v10 = vmul.f32 %v4126_v23, %v4370_v37 }
  0x38   : > { %v4130_v12 = vpop.eup %4129 }
  0x39   : > { %v4132_v15 = vpop.eup %4131  ;;  %575 = vst.msk [vmem:[#allocation2 + $0x40] sm:$0xff] %vm442_vm0, %v566_v10  ;;  %v567_v16 = vmul.f32 %v4130_v12, %v4382_v50  ;;  %v4452_v50 = vsel %vm618_vm1, %v607_v46, %v598_v43  ;;  %v614_v10 = vrot.slane %v4495_v47, 7 }
  0x3a   : > { %v4134_v3 = vpop.eup %4133  ;;  %v4440_v17 = vld [vmem:[#allocation2 + $0x10] sm:$0xff]  ;;  %v1108_v46 = vmul.f32 %v4132_v15, %v4385_v51 }
  0x3b   : > { %v4136_v24 = vpop.eup %4135  ;;  %v634_v37 = vpack.c.bf16 %v4440_v17, %v4418_v32  ;;  %1112 = vst.msk [vmem:[#allocation2 + $0x10] sm:$0xff] %vm442_vm0, %v1104_v8  ;;  %v599_v26 = vrot.slane %v4440_v17, 7  ;;  %576 = vst.msk [vmem:[#allocation2 + $0x50] sm:$0xff] %vm442_vm0, %v567_v16  ;;  %v568_v29 = vmul.f32 %v4134_v3, %v4389_v53 }
  0x3c   : > { %v4138_v20 = vpop.eup %4137  ;;  %v4456_v11 = vld [vmem:[#allocation2 + $0x20] sm:$0xff]  ;;  %v569_v22 = vmul.f32 %v4136_v24, %v4392_v54  ;;  %v1107_v54 = vmul.f32 %v4128_v62, %v4366_v35  ;;  %v4488_v35 = vld [vmem:[#allocation2 + $0x68] sm:$0xff] }
  0x3d   : > { %v4140_v13 = vpop.eup %4139  ;;  %3544 = vmatprep.mubr.msk.bf16.mxu1 %vm442_vm0, %v634_v37  ;;  %v4466_v31 = vld [vmem:[#allocation2 + $0x30] sm:$0xff]  ;;  %1113 = vst.msk [vmem:[#allocation2 + $0x20] sm:$0xff] %vm442_vm0, %v1105_v28  ;;  %v600_v53 = vrot.slane %v4456_v11, 7  ;;  %v4474_v33 = vsel %vm618_vm1, %v608_v49, %v599_v26  ;;  %577 = vst.msk [vmem:[#allocation2 + $0x60] sm:$0xff] %vm442_vm0, %v568_v29  ;;  %v1086_v34 = vadd.f32 1.0, %v4138_v20  ;;  %v613_v62 = vrot.slane %v4488_v35, 7 }
  0x3e   : > { %v4142_v38 = vpop.eup %4141  ;;  %v635_v39 = vpack.c.bf16 %v4466_v31, %v4456_v11  ;;  %1114 = vst.msk [vmem:[#allocation2 + $0x30] sm:$0xff] %vm442_vm0, %v1106_v18  ;;  %v601_v41 = vrot.slane %v4466_v31, 7  ;;  %v628_v43 = vpack.c.bf16 %v4474_v33, %v4452_v50  ;;  %578 = vst.msk [vmem:[#allocation2 + $0x70] sm:$0xff] %vm442_vm0, %v569_v22  ;;  %v1109_v51 = vmul.f32 %v4140_v13, %v4395_v55 }
  0x3f   : > { %v4144_v44 = vpop.eup %4143  ;;  %v621_v45 = vsel %vm618_vm1, %v609_v7, %v600_v53  ;;  %4145 = vrcp.f32 %v1086_v34  ;;  %v546_v48 = vadd.f32 1.0, %v4142_v38 }
  0x40   : > { %3545 = vmatmul.mubr.msk.bf16.vlgmr.msra.gmra.mrb[0].mxu1 %vm442_vm0, %v635_v39  ;;  %v4503_v56 = vld [vmem:[#allocation2 + $0x40] sm:$0xff]  ;;  %v4509_v57 = vsel %vm618_vm1, %v610_v21, %v601_v41  ;;  %3554 = vmatprep.mubr.msk.bf16.mxu0 %vm442_vm0, %v628_v43  ;;  %v1087_v63 = vadd.f32 1.0, %v4144_v44  ;;  %v807_v26 = vpack.c.bf16 %v621_v45, %v4474_v33  ;;  %v4586_v43 = vld [vmem:[#allocation2 + $0x88] sm:$0xff] }
  0x41   : > { %3583 = vmatpush3.bf16.msra.mxu1 %v4309_v4  ;;  %v602_v60 = vrot.slane %v4503_v56, 7  ;;  %v629_v61 = vpack.c.bf16 %v4509_v57, %v621_v45  ;;  %1115 = vst.msk [vmem:[#allocation2 + $0x40] sm:$0xff] %vm442_vm0, %v1107_v54  ;;  %4147 = vrcp.f32 %v546_v48 }
  0x42   : > { %v4518_v0 = vld [vmem:[#allocation2 + $0x50] sm:$0xff]  ;;  %3592 = vmatprep.subr.bf16.mxu1 %v4463_v27  ;;  %4149 = vrcp.f32 %v1087_v63 }
  0x43   : > { %v4520_v2 = vld [vmem:[#allocation2 + $0x10] sm:$0xff]  ;;  %v623_v55 = vsel %vm618_vm1, %v611_v42, %v602_v60  ;;  %3555 = vmatmul.mubr.msk.bf16.vlgmr.msra.gmra.mrb[0].mxu0 %vm442_vm0, %v629_v61  ;;  %v636_v4 = vpack.c.bf16 %v4518_v0, %v4503_v56  ;;  %1116 = vst.msk [vmem:[#allocation2 + $0x50] sm:$0xff] %vm442_vm0, %v1108_v46  ;;  %v603_v23 = vrot.slane %v4518_v0, 7  ;;  %v615_v60 = vrot.slane %v4586_v43, 7  ;;  %v4729_v43 = vld [vmem:[%s5174_s9] sm:$0xff]  }
  0x44   : > { %v4533_v8 = vld [vmem:[#allocation2 + $0x60] sm:$0xff]  ;;  %3563 = vmatpush3.bf16.msra.mxu0 %v4317_v5  ;;  %v1171_v16 = vpack.c.bf16 %v4520_v2, %v4418_v32  ;;  %v1139_v39 = vrot.slane %v4520_v2, 7  ;;  %v808_v45 = vpack.c.bf16 %v623_v55, %v4509_v57 }
  0x45   : > { %3548 = vmatprep.mubr.msk.bf16.mxu1 %vm442_vm0, %v636_v4  ;;  %v4538_v12 = vld [vmem:[#allocation2 + $0x70] sm:$0xff]  ;;  %1117 = vst.msk [vmem:[#allocation2 + $0x60] sm:$0xff] %vm442_vm0, %v1109_v51  ;;  %v624_v15 = vsel %vm618_vm1, %v612_v59, %v603_v23  ;;  %v604_v28 = vrot.slane %v4533_v8, 7  ;;  %3572 = vmatprep.subr.bf16.mxu0 %v4500_v52  ;;  %v4556_v37 = vld [vmem:[#allocation2 + $0x20] sm:$0xff]  ;;  %v907_v36 = vpack.c.bf16 %v4533_v8, %v4518_v0 }
  0x46   : > { %v637_v5 = vpack.c.bf16 %v4538_v12, %v4533_v8  ;;  %v630_v3 = vpack.c.bf16 %v624_v15, %v623_v55  ;;  %v605_v18 = vrot.slane %v4538_v12, 7  ;;  %v4565_v29 = vld [vmem:[#allocation2 + $0x30] sm:$0xff]  ;;  %v1157_v51 = vsel %vm618_vm1, %v608_v49, %v1139_v39 }
  0x47   : > { %v625_v24 = vsel %vm618_vm1, %v613_v62, %v604_v28  ;;  %v1172_v34 = vpack.c.bf16 %v4565_v29, %v4556_v37  ;;  %v1140_v61 = vrot.slane %v4556_v37, 7  ;;  %v1165_v49 = vpack.c.bf16 %v1157_v51, %v4452_v50  ;;  %v4028_v39 = vld [vmem:[%s5174_s9 + $0x130] sm:$0xff]  }
  0x48   : > { %3549 = vmatmul.mubr.msk.bf16.gmra.mrb[4].mxu1 %vm442_vm0, %v637_v5  ;;  %3558 = vmatprep.mubr.msk.bf16.mxu0 %vm442_vm0, %v630_v3  ;;  %v626_v32 = vsel %vm618_vm1, %v614_v10, %v605_v18  ;;  %v4568_v13 = vld [vmem:[#allocation2 + $0x40] sm:$0xff] }
  0x49   : > { %v4146_v20 = vpop.eup %4145  ;;  %v631_v22 = vpack.c.bf16 %v626_v32, %v625_v24  ;;  %3584 = vmatprep.mubr.msk.bf16.mxu1 %vm442_vm0, %v1171_v16  ;;  %v1158_v50 = vsel %vm618_vm1, %v609_v7, %v1140_v61  ;;  %v1443_v3 = vpack.c.bf16 %v4568_v13, %v4565_v29 }
  0x4a   : > { %v1110_v53 = vmul.f32 %v4146_v20, %v4400_v58  ;;  %v4571_v33 = vld [vmem:[#allocation2 + $0x50] sm:$0xff] }
  0x4b   : > { %v4148_v54 = vpop.eup %4147  ;;  %3559 = vmatmul.mubr.msk.bf16.gmra.mrb[4].mxu0 %vm442_vm0, %v631_v22  ;;  %v1173_v41 = vpack.c.bf16 %v4571_v33, %v4568_v13  ;;  %v4013_v58 = vld [vmem:[%s5170_s5 + $0x10] sm:$0xff]   ;;  %v1143_v55 = vrot.slane %v4571_v33, 7  ;;  %v4021_v22 = vld [vmem:[%s5174_s9 + $0x58] sm:$0xff]  }
  0x4c   : > { %1118 = vst.msk [vmem:[#allocation2 + $0x70] sm:$0xff] %vm442_vm0, %v1110_v53  ;;  %3564 = vmatprep.mubr.msk.bf16.mxu0 %vm442_vm0, %v807_v26  ;;  %v570_v38 = vmul.f32 %v4148_v54, %v4409_v9  ;;  %v4150_v44 = vpop.eup %4149  ;;  %v4589_v46 = vld [vmem:[#allocation2 + $0x60] sm:$0xff]  ;;  %v809_v9 = vpack.c.bf16 %v625_v24, %v624_v15  ;;  %v905_v15 = vpack.c.bf16 %v4456_v11, %v4440_v17  ;;  %v4017_v26 = vld [vmem:[%s5174_s9 + $0x48] sm:$0xff]   ;;  %v4020_v20 = vld [vmem:[%s5174_s9 + $0x110] sm:$0xff]  }
  0x4d   : > { %v1111_v48 = vmul.f32 %v4150_v44, %v4412_v14  ;;  %v1142_v14 = vrot.slane %v4568_v13, 7  ;;  %v1161_v17 = vsel %vm618_vm1, %v612_v59, %v1143_v55  ;;  %v1144_v25 = vrot.slane %v4589_v46, 7  ;;  %v4022_v13 = vld [vmem:[%s5174_s9 + $0x118] sm:$0xff]   ;;  %v4023_v53 = vld [vmem:[%s5174_s9 + $0x60] sm:$0xff]   ;;  %v4025_v54 = vld [vmem:[%s5174_s9 + $0x68] sm:$0xff]  }
  0x4e   : > { %579 = vst.msk [vmem:[#allocation2 + $0x80] sm:$0xff] %vm442_vm0, %v570_v38  ;;  %v1444_v18 = vpack.c.bf16 %v4589_v46, %v4571_v33  ;;  %v4024_v33 = vld [vmem:[%s5174_s9 + $0x120] sm:$0xff]   ;;  %v4027_v38 = vld [vmem:[%s5174_s9 + $0x70] sm:$0xff]  }
  0x4f   : > { %v1160_v16 = vsel %vm618_vm1, %v611_v42, %v1142_v14  ;;  %v1162_v42 = vsel %vm618_vm1, %v613_v62, %v1144_v25  ;;  %v4735_v44 = vld [vmem:[%s5174_s9 + $0x140] sm:$0xff]  }
  0x50   : > { %3585 = vmatmul.mubr.msk.bf16.vlgmr.msra.gmra.mrb[8].mxu1 %vm442_vm0, %v1172_v34  ;;  %v1167_v11 = vpack.c.bf16 %v1161_v17, %v1160_v16  ;;  %v1346_v62 = vpack.c.bf16 %v1162_v42, %v1161_v17  ;;  %v4026_v34 = vld [vmem:[%s5174_s9 + $0x128] sm:$0xff]  }
  0x51   : > { %3593 = vmatpush3.bf16.msra.mxu1 %v4463_v27  ;;  %3588 = vmatprep.mubr.msk.bf16.mxu1 %vm442_vm0, %v1173_v41  ;;  %v1141_v27 = vrot.slane %v4565_v29, 7  ;;  %v4019_v29 = vld [vmem:[%s5174_s9 + $0x50] sm:$0xff]   ;;  %v4029_v41 = vld [vmem:[%s5174_s9 + $0x78] sm:$0xff]  }
  0x52   : > { %3602 = vmatprep.subr.bf16.mxu1 %v4013_v58 }
  0x53   : > { %3565 = vmatmul.mubr.msk.bf16.vlgmr.msra.gmra.mrb[0].mxu0 %vm442_vm0, %v808_v45  ;;  %v4600_v57 = vld [vmem:[#allocation2 + $0x70] sm:$0xff] }
  0x54   : > { %v1174_v63 = vpack.c.bf16 %v4600_v57, %v4589_v46  ;;  %3568 = vmatprep.mubr.msk.bf16.mxu0 %vm442_vm0, %v809_v9  ;;  %3573 = vmatpush3.bf16.msra.mxu0 %v4500_v52  ;;  %v1159_v52 = vsel %vm618_vm1, %v610_v21, %v1141_v27  ;;  %v1145_v7 = vrot.slane %v4600_v57, 7  ;;  %v906_v21 = vpack.c.bf16 %v4503_v56, %v4466_v31 }
  0x55   : > { %v596_v40 = vld [vmem:[#allocation2 + $0x80] sm:$0xff]  ;;  %v1166_v6 = vpack.c.bf16 %v1159_v52, %v1158_v50  ;;  %v1344_v56 = vpack.c.bf16 %v1158_v50, %v1157_v51  ;;  %v1345_v47 = vpack.c.bf16 %v1160_v16, %v1159_v52 }
  0x56   : > { %v606_v4 = vrot.slane %v596_v40, 7  ;;  %1119 = vst.msk [vmem:[#allocation2 + $0x80] sm:$0xff] %vm442_vm0, %v1111_v48  ;;  %v1163_v59 = vsel %vm618_vm1, %v614_v10, %v1145_v7  ;;  %v908_v0 = vpack.c.bf16 %v596_v40, %v4538_v12  ;;  %v1442_v12 = vpack.c.bf16 %v4556_v37, %v4520_v2  ;;  %v4015_v2 = vld [vmem:[%s5174_s9 + $0x40] sm:$0xff]  }
  0x57   : > { %v1168_v31 = vpack.c.bf16 %v1163_v59, %v1162_v42  ;;  %v4016_v37 = vld [vmem:[%s5174_s9 + $0x100] sm:$0xff]  }
  0x58   : > { %3589 = vmatmul.mubr.msk.bf16.gmra.mrb[12].mxu1 %vm442_vm0, %v1174_v63  ;;  %v627_v23 = vsel %vm618_vm1, %v615_v60, %v606_v4  ;;  %3718 = vmatprep.subr.bf16.mxu0 %v4016_v37  ;;  %v3122_v63 = vld [vmem:[%s5177_s12] ss:$0 sm:$0xff] }
  0x59   : > { %v810_v28 = vpack.c.bf16 %v627_v23, %v626_v32  ;;  %3594 = vmatprep.mubr.msk.bf16.mxu1 %vm442_vm0, %v1165_v49  ;;  %v4018_v32 = vld [vmem:[%s5174_s9 + $0x108] sm:$0xff]  }
  0x5b   : > { %3569 = vmatmul.mubr.msk.bf16.gmra.mrb[4].mxu0 %vm442_vm0, %v810_v28 }
  0x5c   : > { %3574 = vmatprep.mubr.msk.bf16.mxu0 %vm442_vm0, %v905_v15 }
  0x5d   : > { %v1136_v35 = vld [vmem:[#allocation2 + $0x80] sm:$0xff] }
  0x5e   : > { %v1146_v8 = vrot.slane %v1136_v35, 7  ;;  %v1445_v24 = vpack.c.bf16 %v1136_v35, %v4600_v57 }
  0x60   : > { %3595 = vmatmul.mubr.msk.bf16.vlgmr.msra.gmra.mrb[8].mxu1 %vm442_vm0, %v1166_v6  ;;  %v1164_v10 = vsel %vm618_vm1, %v615_v60, %v1146_v8 }
  0x61   : > { %3603 = vmatpush3.bf16.msra.mxu1 %v4013_v58  ;;  %3598 = vmatprep.mubr.msk.bf16.mxu1 %vm442_vm0, %v1167_v11  ;;  %v1347_v5 = vpack.c.bf16 %v1164_v10, %v1163_v59  ;;  %v4030_v58 = vld [vmem:[%s5174_s9 + $0x138] sm:$0xff]   ;;  %v3161_v10 = vld [vmem:[%s5173_s8] ss:$0 sm:$0xff] }
  0x62   : > { %3612 = vmatprep.subr.bf16.mxu1 %v4014_v19 }
  0x63   : > { %3575 = vmatmul.mubr.msk.bf16.vlgmr.msra.gmra.mrb[0].mxu0 %vm442_vm0, %v906_v21 }
  0x64   : > { %3578 = vmatprep.mubr.msk.bf16.mxu0 %vm442_vm0, %v907_v36  ;;  %3719 = vmatpush3.bf16.msra.mxu0 %v4016_v37 }
  0x65   : > { %3720 = vmatprep.subr.bf16.mxu0 %v4018_v32 }
  0x68   : > { %3599 = vmatmul.mubr.msk.bf16.gmra.mrb[12].mxu1 %vm442_vm0, %v1168_v31  ;;  %3721 = vmatpush3.bf16.msra.mxu0 %v4018_v32 }
  0x69   : > { %3604 = vmatprep.mubr.msk.bf16.mxu1 %vm442_vm0, %v1344_v56  ;;  %3722 = vmatprep.subr.bf16.mxu0 %v4020_v20 }
  0x6b   : > { %3579 = vmatmul.mubr.msk.bf16.gmra.mrb[4].mxu0 %vm442_vm0, %v908_v0  ;;  %v3159_v0 = vld [vmem:[%s5171_s6] ss:$0 sm:$0xff] }
  0x6c   : > { %3723 = vmatpush3.bf16.msra.mxu0 %v4020_v20 }
  0x6d   : > { %3724 = vmatprep.subr.bf16.mxu0 %v4022_v13 }
  0x70   : > { %3605 = vmatmul.mubr.msk.bf16.vlgmr.msra.gmra.mrb[8].mxu1 %vm442_vm0, %v1345_v47  ;;  %3725 = vmatpush3.bf16.msra.mxu0 %v4022_v13  ;;  %v3160_v47 = vld [vmem:[%s5172_s7] ss:$0 sm:$0xff] }
  0x71   : > { %3613 = vmatpush3.bf16.msra.mxu1 %v4014_v19  ;;  %3608 = vmatprep.mubr.msk.bf16.mxu1 %vm442_vm0, %v1346_v62 }
  0x72   : > { %3622 = vmatprep.subr.bf16.mxu1 %v4015_v2  ;;  %3726 = vmatprep.subr.bf16.mxu0 %v4024_v33 }
  0x74   : > { %3727 = vmatpush3.bf16.msra.mxu0 %v4024_v33 }
  0x75   : > { %3728 = vmatprep.subr.bf16.mxu0 %v4026_v34 }
  0x78   : > { %3609 = vmatmul.mubr.msk.bf16.gmra.mrb[12].mxu1 %vm442_vm0, %v1347_v5  ;;  %3729 = vmatpush3.bf16.msra.mxu0 %v4026_v34 }
  0x79   : > { %3614 = vmatprep.mubr.msk.bf16.mxu1 %vm442_vm0, %v1442_v12  ;;  %3730 = vmatprep.subr.bf16.mxu0 %v4028_v39 }
  0x7c   : > { %3731 = vmatpush3.bf16.msra.mxu0 %v4028_v39 }
  0x7d   : > { %3732 = vmatprep.subr.bf16.mxu0 %v4030_v58 }
  0x80   : > { %3615 = vmatmul.mubr.msk.bf16.vlgmr.msra.gmra.mrb[8].mxu1 %vm442_vm0, %v1443_v3  ;;  %3733 = vmatpush3.bf16.msra.mxu0 %v4030_v58 }
  0x81   : > { %3618 = vmatprep.mubr.msk.bf16.mxu1 %vm442_vm0, %v1444_v18  ;;  %3623 = vmatpush3.bf16.msra.mxu1 %v4015_v2 }
  0x82   : > { %3624 = vmatprep.subr.bf16.mxu1 %v4017_v26  ;;  %3742 = vmatprep.subr.bf16.mxu0 %v4735_v44 }
  0x85   : > { %3625 = vmatpush3.bf16.msra.mxu1 %v4017_v26 }
  0x86   : > { %3626 = vmatprep.subr.bf16.mxu1 %v4019_v29 }
  0x88   : > { %3619 = vmatmul.mubr.msk.bf16.gmra.mrb[12].mxu1 %vm442_vm0, %v1445_v24 }
  0x89   : > { %3627 = vmatpush3.bf16.msra.mxu1 %v4019_v29 }
  0x8a   : > { %3628 = vmatprep.subr.bf16.mxu1 %v4021_v22 }
  0x8d   : > { %3629 = vmatpush3.bf16.msra.mxu1 %v4021_v22 }
  0x8e   : > { %3630 = vmatprep.subr.bf16.mxu1 %v4023_v53 }
  0x91   : > { %3631 = vmatpush3.bf16.msra.mxu1 %v4023_v53 }
  0x92   : > { %3632 = vmatprep.subr.bf16.mxu1 %v4025_v54 }
  0x95   : > { %3633 = vmatpush3.bf16.msra.mxu1 %v4025_v54 }
  0x96   : > { %3634 = vmatprep.subr.bf16.mxu1 %v4027_v38 }
  0x99   : > { %3635 = vmatpush3.bf16.msra.mxu1 %v4027_v38 }
  0x9a   : > { %3636 = vmatprep.subr.bf16.mxu1 %v4029_v41 }
  0x9d   : > { %3637 = vmatpush3.bf16.msra.mxu1 %v4029_v41 }
  0x9e   : > { %3646 = vmatprep.subr.bf16.mxu1 %v4729_v43 }
 0x113   : > { %v3546_v45 = vpop.f32.mrb[0].mxu1 }
 0x114   : > { %v693_v46 = vpop.f32.mrb[1].mxu1 }
 0x115   : > { %v3547_v9 = vpop.f32.mrb[2].mxu1 }
 0x116   : > { %v696_v48 = vpop.f32.mrb[3].mxu1 }
 0x11b   : > { %v3550_v51 = vpop.f32.mrb[4].mxu1 }
 0x11c   : > { %v709_v57 = vpop.f32.mrb[5].mxu1 }
 0x11d   : > { %v3551_v60 = vpop.f32.mrb[6].mxu1 }
 0x11e   : > { %v712_v61 = vpop.f32.mrb[7].mxu1 }
 0x136   : > { %v3576_v27 = vpop.f32.mrb[0].mxu0 }
 0x137   : > { %v3838_v14 = vadd.f32 %v3576_v27, %v3546_v45  ;;  %v964_v40 = vpop.f32.mrb[1].mxu0 }
 0x138   : > { %v3846_v49 = vadd.f32 %v964_v40, %v693_v46  ;;  %v3577_v55 = vpop.f32.mrb[2].mxu0 }
 0x139   : > { %v3839_v4 = vadd.f32 %v3838_v14, %v3122_v63  ;;  %v3854_v23 = vadd.f32 %v3577_v55, %v3547_v9  ;;  %v967_v15 = vpop.f32.mrb[3].mxu0 }
 0x13a   : > { %v3847_v28 = vadd.f32 %v3846_v49, %v3122_v63  ;;  %v3862_v50 = vadd.f32 %v967_v15, %v696_v48 }
 0x13b   : > { %3840 = vst [vmem:[%s4745_s19 + $0x10] sm:$0xff] %v3839_v4  ;;  %v3855_v52 = vadd.f32 %v3854_v23, %v3122_v63 }
 0x13c   : > { %3848 = vst [vmem:[%s4745_s19] sm:$0xff] %v3847_v28  ;;  %v3863_v16 = vadd.f32 %v3862_v50, %v3122_v63 }
 0x13d   : > { %3856 = vst [vmem:[%s4745_s19 + $0x18] sm:$0xff] %v3855_v52 }
 0x13e   : > { %3864 = vst [vmem:[%s4745_s19 + $0x8] sm:$0xff] %v3863_v16  ;;  %v3580_v17 = vpop.f32.mrb[4].mxu0 }
 0x13f   : > { %v3870_v6 = vadd.f32 %v3580_v17, %v3550_v51  ;;  %v980_v25 = vpop.f32.mrb[5].mxu0 }
 0x140   : > { %v3878_v7 = vadd.f32 %v980_v25, %v709_v57  ;;  %v3581_v11 = vpop.f32.mrb[6].mxu0 }
 0x141   : > { %v3871_v19 = vadd.f32 %v3870_v6, %v3122_v63  ;;  %v3886_v21 = vadd.f32 %v3581_v11, %v3551_v60  ;;  %v983_v36 = vpop.f32.mrb[7].mxu0 }
 0x142   : > { %v3879_v42 = vadd.f32 %v3878_v7, %v3122_v63  ;;  %v3894_v59 = vadd.f32 %v983_v36, %v712_v61 }
 0x143   : > { %3872 = vst [vmem:[%s4745_s19 + $0x30] sm:$0xff] %v3871_v19  ;;  %v3887_v31 = vadd.f32 %v3886_v21, %v3122_v63 }
 0x144   : > { %3880 = vst [vmem:[%s4745_s19 + $0x20] sm:$0xff] %v3879_v42  ;;  %v3895_v56 = vadd.f32 %v3894_v59, %v3122_v63 }
 0x145   : > { %3888 = vst [vmem:[%s4745_s19 + $0x38] sm:$0xff] %v3887_v31 }
 0x146   : > { %3896 = vst [vmem:[%s4745_s19 + $0x28] sm:$0xff] %v3895_v56 }
 0x153   : > { %v3616_v35 = vpop.f32.mrb[8].mxu1 }
 0x154   : > { %v1549_v62 = vadd.f32 %v3616_v35, %v3159_v0  ;;  %v1501_v8 = vpop.f32.mrb[9].mxu1 }
 0x155   : > { %v1547_v5 = vadd.f32 %v3159_v0, %v1501_v8  ;;  %v3617_v12 = vpop.f32.mrb[10].mxu1 }
 0x156   : > { %v1564_v3 = vmul.f32 %v3160_v47, %v1549_v62  ;;  %v1550_v18 = vadd.f32 %v3617_v12, %v3159_v0  ;;  %v1504_v24 = vpop.f32.mrb[11].mxu1 }
 0x157   : > { %v1562_v2 = vmul.f32 %v3160_v47, %v1547_v5  ;;  %v1548_v37 = vadd.f32 %v3159_v0, %v1504_v24 }
 0x158   : > { %v4764_v26 = vadd.f32 %v3161_v10, %v1564_v3  ;;  %v1565_v32 = vmul.f32 %v3160_v47, %v1550_v18 }
 0x159   : > { %v4766_v29 = vadd.f32 %v3161_v10, %v1562_v2  ;;  %v1563_v20 = vmul.f32 %v3160_v47, %v1548_v37 }
 0x15a   : > { %v3164_v22 = vmul.f32 -1.442695, %v4764_v26  ;;  %v4769_v13 = vadd.f32 %v3161_v10, %v1565_v32 }
 0x15b   : > { %v3162_v53 = vmul.f32 -1.442695, %v4766_v29  ;;  %v4772_v33 = vadd.f32 %v3161_v10, %v1563_v20  ;;  %v3620_v54 = vpop.f32.mrb[12].mxu1 }
 0x15c   : > { %4151 = vpow2.f32 %v3164_v22  ;;  %v3165_v34 = vmul.f32 -1.442695, %v4769_v13  ;;  %v1553_v38 = vadd.f32 %v3620_v54, %v3159_v0  ;;  %v1517_v39 = vpop.f32.mrb[13].mxu1 }
 0x15d   : > { %4153 = vpow2.f32 %v3162_v53  ;;  %v3163_v41 = vmul.f32 -1.442695, %v4772_v33  ;;  %v1551_v58 = vadd.f32 %v3159_v0, %v1517_v39  ;;  %v3621_v45 = vpop.f32.mrb[14].mxu1 }
 0x15e   : > { %4155 = vpow2.f32 %v3165_v34  ;;  %v1568_v46 = vmul.f32 %v3160_v47, %v1553_v38  ;;  %v1554_v9 = vadd.f32 %v3621_v45, %v3159_v0  ;;  %v1520_v48 = vpop.f32.mrb[15].mxu1  ;;  %v4034_v34 = vld [vmem:[%s5174_s9 + $0x148] sm:$0xff]  }
 0x15f   : > { %4157 = vpow2.f32 %v3163_v41  ;;  %v1566_v51 = vmul.f32 %v3160_v47, %v1551_v58  ;;  %v1552_v57 = vadd.f32 %v3159_v0, %v1520_v48 }
 0x160   : > { %v4776_v60 = vadd.f32 %v3161_v10, %v1568_v46  ;;  %v1569_v61 = vmul.f32 %v3160_v47, %v1554_v9 }
 0x161   : > { %v4778_v27 = vadd.f32 %v3161_v10, %v1566_v51  ;;  %v1567_v63 = vmul.f32 %v3160_v47, %v1552_v57  ;;  %v4790_v47 = vrot.slane %v4191_v1, 1 }
 0x162   : > { %v3168_v14 = vmul.f32 -1.442695, %v4776_v60  ;;  %v4781_v40 = vadd.f32 %v3161_v10, %v1569_v61 }
 0x163   : > { %v3166_v49 = vmul.f32 -1.442695, %v4778_v27  ;;  %v4784_v55 = vadd.f32 %v3161_v10, %v1567_v63  ;;  %v4794_v10 = vrot.slane %v4191_v1, 7 }
 0x164   : > { %4159 = vpow2.f32 %v3168_v14  ;;  %v3169_v4 = vmul.f32 -1.442695, %v4781_v40 }
 0x165   : > { %4161 = vpow2.f32 %v3166_v49  ;;  %v3167_v23 = vmul.f32 -1.442695, %v4784_v55 }
 0x166   : > { %v4152_v15 = vpop.eup %4151  ;;  %4163 = vpow2.f32 %v3169_v4 }
 0x167   : > { %v4154_v28 = vpop.eup %4153  ;;  %v1611_v50 = vadd.f32 1.0, %v4152_v15  ;;  %4165 = vpow2.f32 %v3167_v23 }
 0x168   : > { %v4156_v52 = vpop.eup %4155  ;;  %v1609_v16 = vadd.f32 1.0, %v4154_v28  ;;  %v4035_v28 = vld [vmem:[%s5174_s9 + $0x10] sm:$0xff]  }
 0x169   : > { %v4158_v17 = vpop.eup %4157  ;;  %4167 = vrcp.f32 %v1611_v50  ;;  %v1612_v6 = vadd.f32 1.0, %v4156_v52 }
 0x16a   : > { %4169 = vrcp.f32 %v1609_v16  ;;  %v1610_v25 = vadd.f32 1.0, %v4158_v17 }
 0x16b   : > { %4171 = vrcp.f32 %v1612_v6 }
 0x16c   : > { %4173 = vrcp.f32 %v1610_v25 }
 0x16e   : > { %v4160_v7 = vpop.eup %4159 }
 0x16f   : > { %v4162_v11 = vpop.eup %4161  ;;  %v1615_v19 = vadd.f32 1.0, %v4160_v7 }
 0x170   : > { %v4164_v21 = vpop.eup %4163  ;;  %v1613_v36 = vadd.f32 1.0, %v4162_v11 }
 0x171   : > { %v4166_v42 = vpop.eup %4165  ;;  %4175 = vrcp.f32 %v1615_v19  ;;  %v1616_v59 = vadd.f32 1.0, %v4164_v21 }
 0x172   : > { %4177 = vrcp.f32 %v1613_v36  ;;  %v1614_v31 = vadd.f32 1.0, %v4166_v42  ;;  %v4037_v36 = vld [vmem:[%s5174_s9 + $0x18] sm:$0xff]  }
 0x173   : > { %v4168_v56 = vpop.eup %4167  ;;  %4179 = vrcp.f32 %v1616_v59 }
 0x174   : > { %v4170_v0 = vpop.eup %4169  ;;  %v1635_v35 = vmul.f32 %v4168_v56, %v4764_v26  ;;  %4181 = vrcp.f32 %v1614_v31 }
 0x175   : > { %v4172_v62 = vpop.eup %4171  ;;  %v1633_v8 = vmul.f32 %v4170_v0, %v4766_v29 }
 0x176   : > { %v4174_v5 = vpop.eup %4173  ;;  %v1673_v12 = vrot.slane %v1635_v35, 7  ;;  %v1636_v3 = vmul.f32 %v4172_v62, %v4769_v13  ;;  %v1703_v18 = vrot.slane %v1635_v35, 1  ;;  %v4033_v13 = vld [vmem:[%s5174_s9 + $0x8] sm:$0xff]   ;;  %v4038_v62 = vld [vmem:[%s5174_s9 + $0x158] sm:$0xff]  }
 0x177   : > { %v1634_v24 = vmul.f32 %v4174_v5, %v4772_v33  ;;  %v1751_v2 = vpack.c.bf16 %v1633_v8, %v4191_v1  ;;  %v1671_v37 = vrot.slane %v1633_v8, 7  ;;  %v1701_v26 = vrot.slane %v1633_v8, 1 }
 0x178   : > { %v2283_v32 = vpack.c.bf16 %v1636_v3, %v1635_v35  ;;  %v1704_v20 = vrot.slane %v1636_v3, 1  ;;  %v4803_v29 = vsel %vm1720_vm2, %v1703_v18, %v4790_v47  ;;  %v4828_v58 = vsel %vm618_vm1, %v4794_v10, %v1673_v12 }
 0x179   : > { %v1672_v22 = vrot.slane %v1634_v24, 7  ;;  %3638 = vmatprep.mubr.bf16.mxu1 %v1751_v2  ;;  %v4805_v53 = vpack.c.bf16 %v1635_v35, %v1634_v24  ;;  %v2282_v54 = vpack.c.bf16 %v1634_v24, %v1633_v8  ;;  %v4813_v33 = vsel %vm618_vm1, %v4794_v10, %v1671_v37  ;;  %v4039_v37 = vld [vmem:[%s5174_s9 + $0x20] sm:$0xff]  }
 0x17a   : > { %v1731_v38 = vpack.c.bf16 %v4813_v33, %v4794_v10  ;;  %v1702_v39 = vrot.slane %v1634_v24, 1  ;;  %v4823_v41 = vsel %vm1720_vm2, %v1704_v20, %v4790_v47  ;;  %v4834_v46 = vsel %vm1720_vm2, %v1701_v26, %v4790_v47 }
 0x17b   : > { %v4176_v45 = vpop.eup %4175  ;;  %3639 = vmatmul.mubr.bf16.vlgmr.msra.gmra.mrb[16].mxu1 %v4805_v53  ;;  %3734 = vmatprep.mubr.bf16.mxu0 %v2282_v54  ;;  %v2425_v9 = vpack.c.bf16 %v4823_v41, %v4803_v29  ;;  %v4841_v48 = vsel %vm618_vm1, %v4794_v10, %v1672_v22  ;;  %v1674_v51 = vrot.slane %v1636_v3, 7 }
 0x17c   : > { %v4178_v57 = vpop.eup %4177  ;;  %v1639_v61 = vmul.f32 %v4176_v45, %v4776_v60  ;;  %3647 = vmatpush3.bf16.msra.mxu1 %v4729_v43  ;;  %3735 = vmatmul.mubr.bf16.vlgmr.msra.gmra.mrb[8].mxu0 %v2283_v32  ;;  %v1723_v63 = vsel %vm1720_vm2, %v1702_v39, %v4790_v47  ;;  %v4850_v14 = vpack.c.bf16 %v4828_v58, %v4841_v48  ;;  %v4042_v45 = vld [vmem:[%s5174_s9 + $0x168] sm:$0xff]  }
 0x17d   : > { %v4180_v49 = vpop.eup %4179  ;;  %v1637_v4 = vmul.f32 %v4178_v57, %v4778_v27  ;;  %3743 = vmatpush3.bf16.msra.mxu0 %v4735_v44  ;;  %3648 = vmatprep.subr.bf16.mxu1 %v4033_v13  ;;  %v4855_v23 = vpack.c.bf16 %v4803_v29, %v1723_v63  ;;  %v2424_v43 = vpack.c.bf16 %v1723_v63, %v4834_v46  ;;  %v4036_v27 = vld [vmem:[%s5174_s9 + $0x150] sm:$0xff]   ;;  %v4046_v63 = vld [vmem:[%s5174_s9 + $0x178] sm:$0xff]  }
 0x17e   : > { %v4182_v60 = vpop.eup %4181  ;;  %v4859_v15 = vmul.f32 %v4180_v49, %v4781_v40  ;;  %3744 = vmatprep.subr.bf16.mxu0 %v4034_v34  ;;  %v4870_v44 = vsel %vm618_vm1, %v4794_v10, %v1674_v51  ;;  %v1677_v50 = vrot.slane %v1639_v61, 7  ;;  %v1707_v52 = vrot.slane %v1639_v61, 1  ;;  %v4043_v51 = vld [vmem:[%s5174_s9 + $0x30] sm:$0xff]   ;;  %v4047_v49 = vld [vmem:[%s5174_s9 + $0x80] sm:$0xff]  }
 0x17f   : > { %v1638_v16 = vmul.f32 %v4182_v60, %v4784_v55  ;;  %v4873_v40 = vpack.c.bf16 %v1637_v4, %v1636_v3  ;;  %v1675_v17 = vrot.slane %v1637_v4, 7  ;;  %v2141_v6 = vpack.c.bf16 %v4870_v44, %v4828_v58  ;;  %v4044_v57 = vld [vmem:[%s5174_s9 + $0x170] sm:$0xff]   ;;  %v4050_v60 = vld [vmem:[%s5174_s9 + $0x188] sm:$0xff]  }
 0x180   : > { %3649 = vmatpush3.bf16.msra.mxu1 %v4033_v13  ;;  %v2285_v25 = vpack.c.bf16 %v4859_v15, %v1639_v61  ;;  %v1705_v7 = vrot.slane %v1637_v4, 1  ;;  %v4881_v11 = vsel %vm618_vm1, %v4794_v10, %v1677_v50  ;;  %v1708_v19 = vrot.slane %v4859_v15, 1  ;;  %v4040_v13 = vld [vmem:[%s5174_s9 + $0x160] sm:$0xff]   ;;  %v4053_v50 = vld [vmem:[%s5174_s9 + $0x98] sm:$0xff]   ;;  %v4081_v58 = vld [vmem:[%s5174_s9 + $0x210] sm:$0xff]  }
 0x181   : > { %3745 = vmatpush3.bf16.msra.mxu0 %v4034_v34  ;;  %3642 = vmatprep.mubr.bf16.mxu1 %v4873_v40  ;;  %v4885_v55 = vpack.c.bf16 %v1639_v61, %v1638_v16  ;;  %v2284_v21 = vpack.c.bf16 %v1638_v16, %v1637_v4  ;;  %v4893_v42 = vsel %vm618_vm1, %v4794_v10, %v1675_v17  ;;  %v1706_v59 = vrot.slane %v1638_v16, 1  ;;  %v4045_v61 = vld [vmem:[%s5174_s9 + $0x38] sm:$0xff]   ;;  %v4048_v4 = vld [vmem:[%s5174_s9 + $0x180] sm:$0xff]   ;;  %v4060_v17 = vld [vmem:[%s5174_s9 + $0x1b0] sm:$0xff]  }
 0x182   : > { %3650 = vmatprep.subr.bf16.mxu1 %v4035_v28  ;;  %3746 = vmatprep.subr.bf16.mxu0 %v4036_v27  ;;  %v4897_v31 = vpack.c.bf16 %v4893_v42, %v4870_v44  ;;  %v4902_v56 = vsel %vm1720_vm2, %v1705_v7, %v4790_v47  ;;  %v1676_v0 = vrot.slane %v1638_v16, 7  ;;  %v4907_v35 = vsel %vm1720_vm2, %v1707_v52, %v4790_v47  ;;  %v4057_v52 = vld [vmem:[%s5174_s9 + $0xa8] sm:$0xff]   ;;  %v4062_v7 = vld [vmem:[%s5174_s9 + $0x1b8] sm:$0xff]  }
 0x183   : > { %3643 = vmatmul.mubr.bf16.gmra.mrb[20].mxu1 %v4885_v55  ;;  %3738 = vmatprep.mubr.bf16.mxu0 %v2284_v21  ;;  %v1727_v8 = vsel %vm1720_vm2, %v1706_v59, %v4790_v47  ;;  %v4919_v5 = vsel %vm1720_vm2, %v1708_v19, %v4790_v47  ;;  %v4923_v12 = vpack.c.bf16 %v4902_v56, %v4823_v41  ;;  %v1678_v3 = vrot.slane %v4859_v15, 7  ;;  %v4054_v41 = vld [vmem:[%s5174_s9 + $0x198] sm:$0xff]   ;;  %v4058_v16 = vld [vmem:[%s5174_s9 + $0x1a8] sm:$0xff]   ;;  %v4063_v19 = vld [vmem:[%s5174_s9 + $0xc0] sm:$0xff]  }
 0x184   : > { %3651 = vmatpush3.bf16.msra.mxu1 %v4035_v28  ;;  %3662 = vmatprep.mubr.bf16.mxu1 %v1731_v38  ;;  %v2426_v18 = vpack.c.bf16 %v1727_v8, %v4902_v56  ;;  %v4930_v24 = vsel %vm618_vm1, %v4794_v10, %v1676_v0  ;;  %v2427_v2 = vpack.c.bf16 %v4919_v5, %v4907_v35  ;;  %v4051_v28 = vld [vmem:[%s5174_s9 + $0x90] sm:$0xff]   ;;  %v4064_v21 = vld [vmem:[%s5174_s9 + $0x1c0] sm:$0xff]   ;;  %v4066_v59 = vld [vmem:[%s5174_s9 + $0x1c8] sm:$0xff]  }
 0x185   : > { %3739 = vmatmul.mubr.bf16.gmra.mrb[12].mxu0 %v2285_v25  ;;  %3652 = vmatprep.subr.bf16.mxu1 %v4037_v36  ;;  %v4939_v26 = vpack.c.bf16 %v4881_v11, %v4930_v24  ;;  %v4942_v32 = vpack.c.bf16 %v4907_v35, %v1727_v8  ;;  %v2140_v20 = vpack.c.bf16 %v4841_v48, %v4813_v33  ;;  %v4061_v25 = vld [vmem:[%s5174_s9 + $0xb8] sm:$0xff]   ;;  %v4067_v56 = vld [vmem:[%s5174_s9 + $0xd0] sm:$0xff]   ;;  %v4072_v8 = vld [vmem:[%s5174_s9 + $0x1e0] sm:$0xff]  }
 0x186   : > { %3747 = vmatpush3.bf16.msra.mxu0 %v4036_v27  ;;  %3758 = vmatprep.mubr.bf16.mxu0 %v2424_v43  ;;  %v4949_v22 = vsel %vm618_vm1, %v4794_v10, %v1678_v3  ;;  %v2142_v54 = vpack.c.bf16 %v4930_v24, %v4893_v42  ;;  %v2844_v39 = vpack.c.bf16 %v4790_v47, %v4919_v5  ;;  %v4049_v43 = vld [vmem:[%s5174_s9 + $0x88] sm:$0xff]   ;;  %v4052_v27 = vld [vmem:[%s5174_s9 + $0x190] sm:$0xff]   ;;  %v4069_v35 = vld [vmem:[%s5174_s9 + $0xd8] sm:$0xff]  }
 0x187   : > { %3748 = vmatprep.subr.bf16.mxu0 %v4038_v62  ;;  %v2566_v34 = vpack.c.bf16 %v4794_v10, %v4949_v22  ;;  %v2143_v38 = vpack.c.bf16 %v4949_v22, %v4881_v11  ;;  %v1998_v29 = vpack.c.bf16 %v4834_v46, %v4790_v47  ;;  %v4056_v46 = vld [vmem:[%s5174_s9 + $0x1a0] sm:$0xff]   ;;  %v4068_v0 = vld [vmem:[%s5174_s9 + $0x1d0] sm:$0xff]   ;;  %v4073_v10 = vld [vmem:[%s5174_s9 + $0xe8] sm:$0xff]   ;;  %v2705_v44 = vpack.c.bf16 %v4191_v1, %v4859_v15 }
 0x188   : > { %3653 = vmatpush3.bf16.msra.mxu1 %v4037_v36  ;;  %v4065_v36 = vld [vmem:[%s5174_s9 + $0xc8] sm:$0xff]   ;;  %v4076_v48 = vld [vmem:[%s5174_s9 + $0x1f0] sm:$0xff]   ;;  %v4077_v3 = vld [vmem:[%s5174_s9 + $0xf8] sm:$0xff]  }
 0x189   : > { %3654 = vmatprep.subr.bf16.mxu1 %v4039_v37  ;;  %v4074_v33 = vld [vmem:[%s5174_s9 + $0x1e8] sm:$0xff]   ;;  %v4085_v15 = vld [vmem:[%s5174_s9 + $0x230] sm:$0xff]   ;;  %v3370_v47 = vld [vmem:[%s5175_s10] ss:$0 sm:$0xff] }
 0x18a   : > { %3749 = vmatpush3.bf16.msra.mxu0 %v4038_v62  ;;  %v4071_v62 = vld [vmem:[%s5174_s9 + $0xe0] sm:$0xff]   ;;  %v4084_v1 = vld [vmem:[%s5174_s9 + $0x228] sm:$0xff]  }
 0x18b   : > { %3750 = vmatprep.subr.bf16.mxu0 %v4040_v13 }
 0x18c   : > { %3655 = vmatpush3.bf16.msra.mxu1 %v4039_v37  ;;  %v4080_v37 = vld [vmem:[%s5174_s9 + $0x208] sm:$0xff]  }
 0x18d   : > { %3656 = vmatprep.subr.bf16.mxu1 %v4041_v30 }
 0x18e   : > { %3751 = vmatpush3.bf16.msra.mxu0 %v4040_v13  ;;  %v3841_v13 = vld [vmem:[%s4745_s19 + $0x10] sm:$0xff] }
 0x18f   : > { %3752 = vmatprep.subr.bf16.mxu0 %v4042_v45 }
 0x190   : > { %3657 = vmatpush3.bf16.msra.mxu1 %v4041_v30 }
 0x191   : > { %3658 = vmatprep.subr.bf16.mxu1 %v4043_v51 }
 0x192   : > { %3753 = vmatpush3.bf16.msra.mxu0 %v4042_v45 }
 0x193   : > { %3754 = vmatprep.subr.bf16.mxu0 %v4044_v57 }
 0x194   : > { %3659 = vmatpush3.bf16.msra.mxu1 %v4043_v51 }
 0x195   : > { %3660 = vmatprep.subr.bf16.mxu1 %v4045_v61 }
 0x196   : > { %3755 = vmatpush3.bf16.msra.mxu0 %v4044_v57 }
 0x197   : > { %3756 = vmatprep.subr.bf16.mxu0 %v4046_v63 }
 0x198   : > { %3661 = vmatpush3.bf16.msra.mxu1 %v4045_v61 }
 0x199   : > { %3670 = vmatprep.subr.bf16.mxu1 %v4047_v49 }
 0x19a   : > { %3757 = vmatpush3.bf16.msra.mxu0 %v4046_v63 }
 0x19b   : > { %3663 = vmatmul.mubr.bf16.vlgmr.msra.gmra.mrb[16].mxu1 %v4850_v14  ;;  %3766 = vmatprep.subr.bf16.mxu0 %v4048_v4 }
 0x19c   : > { %3666 = vmatprep.mubr.bf16.mxu1 %v4897_v31  ;;  %3671 = vmatpush3.bf16.msra.mxu1 %v4047_v49 }
 0x19d   : > { %3759 = vmatmul.mubr.bf16.vlgmr.msra.gmra.mrb[8].mxu0 %v2425_v9  ;;  %3672 = vmatprep.subr.bf16.mxu1 %v4049_v43  ;;  %v4055_v9 = vld [vmem:[%s5174_s9 + $0xa0] sm:$0xff]  }
 0x19e   : > { %3762 = vmatprep.mubr.bf16.mxu0 %v2426_v18  ;;  %3767 = vmatpush3.bf16.msra.mxu0 %v4048_v4  ;;  %v4078_v18 = vld [vmem:[%s5174_s9 + $0x1f8] sm:$0xff]  }
 0x19f   : > { %3768 = vmatprep.subr.bf16.mxu0 %v4050_v60 }
 0x1a0   : > { %3673 = vmatpush3.bf16.msra.mxu1 %v4049_v43 }
 0x1a1   : > { %3674 = vmatprep.subr.bf16.mxu1 %v4051_v28 }
 0x1a2   : > { %3769 = vmatpush3.bf16.msra.mxu0 %v4050_v60 }
 0x1a3   : > { %3667 = vmatmul.mubr.bf16.gmra.mrb[20].mxu1 %v4939_v26  ;;  %3770 = vmatprep.subr.bf16.mxu0 %v4052_v27 }
 0x1a4   : > { %3675 = vmatpush3.bf16.msra.mxu1 %v4051_v28  ;;  %3686 = vmatprep.mubr.bf16.mxu1 %v1998_v29 }
 0x1a5   : > { %3763 = vmatmul.mubr.bf16.gmra.mrb[12].mxu0 %v2427_v2  ;;  %3676 = vmatprep.subr.bf16.mxu1 %v4053_v50  ;;  %v4079_v2 = vld [vmem:[%s5174_s9 + $0x200] sm:$0xff]  }
 0x1a6   : > { %3771 = vmatpush3.bf16.msra.mxu0 %v4052_v27  ;;  %3782 = vmatprep.mubr.bf16.mxu0 %v4850_v14  ;;  %v4059_v14 = vld [vmem:[%s5174_s9 + $0xb0] sm:$0xff]  }
 0x1a7   : > { %3772 = vmatprep.subr.bf16.mxu0 %v4054_v41 }
 0x1a8   : > { %3677 = vmatpush3.bf16.msra.mxu1 %v4053_v50  ;;  %v3873_v50 = vld [vmem:[%s4745_s19 + $0x30] sm:$0xff] }
 0x1a9   : > { %3678 = vmatprep.subr.bf16.mxu1 %v4055_v9 }
 0x1aa   : > { %3773 = vmatpush3.bf16.msra.mxu0 %v4054_v41 }
 0x1ab   : > { %3774 = vmatprep.subr.bf16.mxu0 %v4056_v46 }
 0x1ac   : > { %3679 = vmatpush3.bf16.msra.mxu1 %v4055_v9  ;;  %v3881_v9 = vld [vmem:[%s4745_s19 + $0x20] sm:$0xff] }
 0x1ad   : > { %3680 = vmatprep.subr.bf16.mxu1 %v4057_v52 }
 0x1ae   : > { %3775 = vmatpush3.bf16.msra.mxu0 %v4056_v46 }
 0x1af   : > { %3776 = vmatprep.subr.bf16.mxu0 %v4058_v16 }
 0x1b0   : > { %3681 = vmatpush3.bf16.msra.mxu1 %v4057_v52  ;;  %v3889_v52 = vld [vmem:[%s4745_s19 + $0x38] sm:$0xff] }
 0x1b1   : > { %3682 = vmatprep.subr.bf16.mxu1 %v4059_v14 }
 0x1b2   : > { %3777 = vmatpush3.bf16.msra.mxu0 %v4058_v16 }
 0x1b3   : > { %3778 = vmatprep.subr.bf16.mxu0 %v4060_v17 }
 0x1b4   : > { %3683 = vmatpush3.bf16.msra.mxu1 %v4059_v14 }
 0x1b5   : > { %3684 = vmatprep.subr.bf16.mxu1 %v4061_v25 }
 0x1b6   : > { %3779 = vmatpush3.bf16.msra.mxu0 %v4060_v17  ;;  %v3897_v17 = vld [vmem:[%s4745_s19 + $0x28] sm:$0xff] }
 0x1b7   : > { %3780 = vmatprep.subr.bf16.mxu0 %v4062_v7 }
 0x1b8   : > { %3685 = vmatpush3.bf16.msra.mxu1 %v4061_v25 }
 0x1b9   : > { %3694 = vmatprep.subr.bf16.mxu1 %v4063_v19 }
 0x1ba   : > { %3781 = vmatpush3.bf16.msra.mxu0 %v4062_v7 }
 0x1bb   : > { %3687 = vmatmul.mubr.bf16.vlgmr.msra.gmra.mrb[16].mxu1 %v4855_v23  ;;  %3790 = vmatprep.subr.bf16.mxu0 %v4064_v21 }
 0x1bc   : > { %3690 = vmatprep.mubr.bf16.mxu1 %v4923_v12  ;;  %3695 = vmatpush3.bf16.msra.mxu1 %v4063_v19 }
 0x1bd   : > { %3783 = vmatmul.mubr.bf16.vlgmr.msra.gmra.mrb[8].mxu0 %v4897_v31  ;;  %3696 = vmatprep.subr.bf16.mxu1 %v4065_v36  ;;  %v4070_v31 = vld [vmem:[%s5174_s9 + $0x1d8] sm:$0xff]  }
 0x1be   : > { %3786 = vmatprep.mubr.bf16.mxu0 %v4939_v26  ;;  %3791 = vmatpush3.bf16.msra.mxu0 %v4064_v21 }
 0x1bf   : > { %3792 = vmatprep.subr.bf16.mxu0 %v4066_v59 }
 0x1c0   : > { %3697 = vmatpush3.bf16.msra.mxu1 %v4065_v36 }
 0x1c1   : > { %3698 = vmatprep.subr.bf16.mxu1 %v4067_v56 }
 0x1c2   : > { %3793 = vmatpush3.bf16.msra.mxu0 %v4066_v59 }
 0x1c3   : > { %3691 = vmatmul.mubr.bf16.gmra.mrb[20].mxu1 %v4942_v32  ;;  %3794 = vmatprep.subr.bf16.mxu0 %v4068_v0 }
 0x1c4   : > { %3699 = vmatpush3.bf16.msra.mxu1 %v4067_v56  ;;  %3710 = vmatprep.mubr.bf16.mxu1 %v2140_v20 }
 0x1c5   : > { %3787 = vmatmul.mubr.bf16.gmra.mrb[12].mxu0 %v2566_v34  ;;  %3700 = vmatprep.subr.bf16.mxu1 %v4069_v35 }
 0x1c6   : > { %3795 = vmatpush3.bf16.msra.mxu0 %v4068_v0  ;;  %3806 = vmatprep.mubr.bf16.mxu0 %v4805_v53  ;;  %v4075_v53 = vld [vmem:[%s5174_s9 + $0xf0] sm:$0xff]  }
 0x1c7   : > { %3796 = vmatprep.subr.bf16.mxu0 %v4070_v31 }
 0x1c8   : > { %3701 = vmatpush3.bf16.msra.mxu1 %v4069_v35 }
 0x1c9   : > { %3702 = vmatprep.subr.bf16.mxu1 %v4071_v62 }
 0x1ca   : > { %3797 = vmatpush3.bf16.msra.mxu0 %v4070_v31 }
 0x1cb   : > { %3798 = vmatprep.subr.bf16.mxu0 %v4072_v8 }
 0x1cc   : > { %3703 = vmatpush3.bf16.msra.mxu1 %v4071_v62 }
 0x1cd   : > { %3704 = vmatprep.subr.bf16.mxu1 %v4073_v10 }
 0x1ce   : > { %3799 = vmatpush3.bf16.msra.mxu0 %v4072_v8 }
 0x1cf   : > { %3800 = vmatprep.subr.bf16.mxu0 %v4074_v33 }
 0x1d0   : > { %3705 = vmatpush3.bf16.msra.mxu1 %v4073_v10 }
 0x1d1   : > { %3706 = vmatprep.subr.bf16.mxu1 %v4075_v53 }
 0x1d2   : > { %3801 = vmatpush3.bf16.msra.mxu0 %v4074_v33 }
 0x1d3   : > { %3802 = vmatprep.subr.bf16.mxu0 %v4076_v48 }
 0x1d4   : > { %3707 = vmatpush3.bf16.msra.mxu1 %v4075_v53 }
 0x1d5   : > { %3708 = vmatprep.subr.bf16.mxu1 %v4077_v3 }
 0x1d6   : > { %3803 = vmatpush3.bf16.msra.mxu0 %v4076_v48 }
 0x1d7   : > { %3804 = vmatprep.subr.bf16.mxu0 %v4078_v18 }
 0x1d8   : > { %3709 = vmatpush3.bf16.msra.mxu1 %v4077_v3 }
 0x1da   : > { %3805 = vmatpush3.bf16.msra.mxu0 %v4078_v18 }
 0x1db   : > { %3711 = vmatmul.mubr.bf16.vlgmr.msra.gmra.mrb[16].mxu1 %v2141_v6  ;;  %3814 = vmatprep.subr.bf16.mxu0 %v4079_v2  ;;  %v4083_v6 = vld [vmem:[%s5174_s9 + $0x220] sm:$0xff]  }
 0x1dc   : > { %3714 = vmatprep.mubr.bf16.mxu1 %v2142_v54 }
 0x1dd   : > { %3807 = vmatmul.mubr.bf16.vlgmr.msra.gmra.mrb[8].mxu0 %v4873_v40  ;;  %v4082_v40 = vld [vmem:[%s5174_s9 + $0x218] sm:$0xff]  }
 0x1de   : > { %3810 = vmatprep.mubr.bf16.mxu0 %v4885_v55  ;;  %3815 = vmatpush3.bf16.msra.mxu0 %v4079_v2 }
 0x1df   : > { %3816 = vmatprep.subr.bf16.mxu0 %v4080_v37 }
 0x1e2   : > { %3817 = vmatpush3.bf16.msra.mxu0 %v4080_v37 }
 0x1e3   : > { %3715 = vmatmul.mubr.bf16.gmra.mrb[20].mxu1 %v2143_v38  ;;  %3818 = vmatprep.subr.bf16.mxu0 %v4081_v58  ;;  %v3849_v38 = vld [vmem:[%s4745_s19] sm:$0xff] }
 0x1e5   : > { %3811 = vmatmul.mubr.bf16.gmra.mrb[12].mxu0 %v2705_v44 }
 0x1e6   : > { %3819 = vmatpush3.bf16.msra.mxu0 %v4081_v58  ;;  %3830 = vmatprep.mubr.bf16.mxu0 %v4855_v23  ;;  %v4086_v23 = vld [vmem:[%s5174_s9 + $0x238] sm:$0xff]  }
 0x1e7   : > { %3820 = vmatprep.subr.bf16.mxu0 %v4082_v40 }
 0x1ea   : > { %3821 = vmatpush3.bf16.msra.mxu0 %v4082_v40 }
 0x1eb   : > { %3822 = vmatprep.subr.bf16.mxu0 %v4083_v6 }
 0x1ee   : > { %3823 = vmatpush3.bf16.msra.mxu0 %v4083_v6 }
 0x1ef   : > { %3824 = vmatprep.subr.bf16.mxu0 %v4084_v1 }
 0x1f2   : > { %3825 = vmatpush3.bf16.msra.mxu0 %v4084_v1 }
 0x1f3   : > { %3826 = vmatprep.subr.bf16.mxu0 %v4085_v15 }
 0x1f6   : > { %3827 = vmatpush3.bf16.msra.mxu0 %v4085_v15 }
 0x1f7   : > { %3828 = vmatprep.subr.bf16.mxu0 %v4086_v23 }
 0x1fa   : > { %3829 = vmatpush3.bf16.msra.mxu0 %v4086_v23 }
 0x1fd   : > { %3831 = vmatmul.mubr.bf16.vlgmr.msra.gmra.mrb[8].mxu0 %v4923_v12  ;;  %v3857_v12 = vld [vmem:[%s4745_s19 + $0x18] sm:$0xff] }
 0x1fe   : > { %3834 = vmatprep.mubr.bf16.mxu0 %v4942_v32 }
 0x205   : > { %3835 = vmatmul.mubr.bf16.gmra.mrb[12].mxu0 %v2844_v39  ;;  %v3865_v39 = vld [vmem:[%s4745_s19 + $0x8] sm:$0xff] }
 0x2ae   : > { %v3712_v11 = vpop.f32.mrb[16].mxu1 }
 0x2af   : > { %v2243_v55 = vpop.f32.mrb[17].mxu1  ;;  %v3842_v34 = vadd.f32 %v3841_v13, %v3712_v11 }
 0x2b0   : > { %v3713_v42 = vpop.f32.mrb[18].mxu1  ;;  %v3850_v30 = vadd.f32 %v3849_v38, %v2243_v55 }
 0x2b1   : > { %v2246_v24 = vpop.f32.mrb[19].mxu1  ;;  %v3858_v5 = vadd.f32 %v3857_v12, %v3713_v42 }
 0x2b2   : > { %v3866_v57 = vadd.f32 %v3865_v39, %v2246_v24 }
 0x2b6   : > { %v3716_v26 = vpop.f32.mrb[20].mxu1 }
 0x2b7   : > { %v2259_v20 = vpop.f32.mrb[21].mxu1  ;;  %v3874_v41 = vadd.f32 %v3873_v50, %v3716_v26 }
 0x2b8   : > { %v3717_v22 = vpop.f32.mrb[22].mxu1  ;;  %v3882_v46 = vadd.f32 %v3881_v9, %v2259_v20 }
 0x2b9   : > { %v2262_v54 = vpop.f32.mrb[23].mxu1  ;;  %v3890_v14 = vadd.f32 %v3889_v52, %v3717_v22 }
 0x2ba   : > { %v3898_v19 = vadd.f32 %v3897_v17, %v2262_v54 }
 0x2d0   : > { %v3832_v32 = vpop.f32.mrb[8].mxu0 }
 0x2d1   : > { %v3845_v45 = vadd.f32 %v3842_v34, %v3832_v32  ;;  %v2944_v51 = vpop.f32.mrb[9].mxu0 }
 0x2d2   : > { %v3853_v61 = vadd.f32 %v3850_v30, %v2944_v51  ;;  %v3833_v63 = vpop.f32.mrb[10].mxu0 }
 0x2d3   : > { %v3008_v49 = vadd.f32 %v3845_v45, %v3370_v47  ;;  %v3861_v4 = vadd.f32 %v3858_v5, %v3833_v63  ;;  %v2947_v43 = vpop.f32.mrb[11].mxu0 }
 0x2d4   : > { %v3006_v60 = vadd.f32 %v3853_v61, %v3370_v47  ;;  %v3869_v28 = vadd.f32 %v3866_v57, %v2947_v43 }
 0x2d5   : > { %3016 = vst [vmem:[%s4745_s19 + $0x10] sm:$0xff] %v3008_v49  ;;  %v3009_v27 = vadd.f32 %v3861_v4, %v3370_v47 }
 0x2d6   : > { %3014 = vst [vmem:[%s4745_s19] sm:$0xff] %v3006_v60  ;;  %v3007_v29 = vadd.f32 %v3869_v28, %v3370_v47 }
 0x2d7   : > { %3017 = vst [vmem:[%s4745_s19 + $0x18] sm:$0xff] %v3009_v27 }
 0x2d8   : > { %3015 = vst [vmem:[%s4745_s19 + $0x8] sm:$0xff] %v3007_v29  ;;  %v3836_v16 = vpop.f32.mrb[12].mxu0 }
 0x2d9   : > { %v3877_v25 = vadd.f32 %v3874_v41, %v3836_v16  ;;  %v2960_v7 = vpop.f32.mrb[13].mxu0 }
 0x2da   : > { %v3885_v21 = vadd.f32 %v3882_v46, %v2960_v7  ;;  %v3837_v36 = vpop.f32.mrb[14].mxu0 }
 0x2db   : > { %v3012_v59 = vadd.f32 %v3877_v25, %v3370_v47  ;;  %v3893_v56 = vadd.f32 %v3890_v14, %v3837_v36  ;;  %v2963_v0 = vpop.f32.mrb[15].mxu0 }
 0x2dc   : > { %v3010_v35 = vadd.f32 %v3885_v21, %v3370_v47  ;;  %v3901_v31 = vadd.f32 %v3898_v19, %v2963_v0 }
 0x2dd   : > { %3020 = vst [vmem:[%s4745_s19 + $0x30] sm:$0xff] %v3012_v59  ;;  %v3013_v62 = vadd.f32 %v3893_v56, %v3370_v47 }
 0x2de   : > { %3018 = vst [vmem:[%s4745_s19 + $0x20] sm:$0xff] %v3010_v35  ;;  %v3011_v8 = vadd.f32 %v3901_v31, %v3370_v47 }
 0x2df   : > { %3021 = vst [vmem:[%s4745_s19 + $0x38] sm:$0xff] %v3013_v62 }
 0x2e0   : > { %3019 = vst [vmem:[%s4745_s19 + $0x28] sm:$0xff] %v3011_v8 }
 0x2e1 PF: > { %s23_s25 = sadd.s32 1, %s4189_s25  }
 0x2e2   : > { %p20_p4 = scmp.ge.s32.totalorder %s23_s25, 4  }
 0x2e4   :  { %22 = sbr.rel (!%p20_p4) target bundleno = 1 (0x1), region = 119 }

</bundles_post_ra>
